<compile_context>
chip_gen: v6e
topology: v6e:2x2x1
jax: 0.10.0
libtpu: 0.0.40
codegen_flags: <defaults>
</compile_context>

<pallas_src>
import jax
import jax.numpy as jnp
from jax import lax
from jax.experimental import pallas as pl
from jax.experimental.pallas import tpu as pltpu


def _make_kernel(C, hid, attn_dtype, return_attention):
    bf16 = jnp.bfloat16

    def body(xq_ref, xkv_ref, hzt_ref, hzf_ref, wqT_ref, bq_ref, wkv_ref, bkv_ref,
             wf_ref, bf_ref, out_ref, attn_ref, kT_sc, vT_sc):
        qi = pl.program_id(1)   # query tile index == "viewed" output channel (TQ == HW//C)

        # ---- once per batch: fused K|V 1x1-conv projection (block-diagonal packed
        #      weight, one MXU matmul), cached channel-major (lane-dense along HW) in
        #      bf16; also initialise the resident output block with residual + bias. ----
        @pl.when(qi == 0)
        def _():
            kv = jnp.dot(wkv_ref[...], xkv_ref[0],
                         preferred_element_type=jnp.float32) + bkv_ref[...]
            kT_sc[...] = kv[:hid, :].astype(bf16)          # (hid, HW)  K^T projection
            vT_sc[...] = kv[hid:, :].astype(bf16)          # (C,   HW)  V^T projection
            for o in range(C):                             # out = h + bf  (then += conv)
                out_ref[0, o] = hzf_ref[0, o] + bf_ref[o]

        # ---- Q projection for this query tile: natural (TQ, C) @ (C, hid) ------------
        qp = jnp.dot(xq_ref[0], wqT_ref[...],
                     preferred_element_type=jnp.float32) + bq_ref[...]          # (TQ, hid)

        # ---- attention logits + numerically stable softmax, lane-dense along HW ------
        e = jnp.dot(qp.astype(bf16), kT_sc[...],
                    preferred_element_type=jnp.float32)                          # (TQ, HW)
        e_max = jnp.max(e, axis=-1, keepdims=True)
        p = jnp.exp(e - e_max)
        denom = jnp.sum(p, axis=-1, keepdims=True)
        attn = p * pl.reciprocal(denom, approx=True)
        attn_bf = attn.astype(bf16)                        # single cast, reused below
        if return_attention:
            if attn_dtype == bf16:
                attn_ref[0] = attn_bf
            else:
                attn_ref[0] = attn.astype(attn_dtype)

        # ---- z rows of this viewed channel, spatial index on lanes: (C, TQ) ----------
        zT = lax.dot_general(vT_sc[...], attn_bf, (((1,), (1,)), ((), ())),
                             preferred_element_type=jnp.float32)                 # (C, TQ)
        # gate with h in the coordinates of torch's z.view(B, C, H, W)
        g = zT * hzt_ref[0, 0]                                                   # (C, TQ)

        # ---- fused 1x1 output conv: rank-1 channel-mix update of the resident block --
        for o in range(C):
            out_ref[0, o] += wf_ref[o, qi] * g

    if return_attention:
        def kernel(xq, xkv, hzt, hzf, wqT, bq, wkv, bkv, wf, bfb, out, attn, ks, vs):
            body(xq, xkv, hzt, hzf, wqT, bq, wkv, bkv, wf, bfb, out, attn, ks, vs)
    else:
        def kernel(xq, xkv, hzt, hzf, wqT, bq, wkv, bkv, wf, bfb, out, ks, vs):
            body(xq, xkv, hzt, hzf, wqT, bq, wkv, bkv, wf, bfb, out, None, ks, vs)
    return kernel


def _vmem_limit_bytes(C, HW, hid, TQ, attn_itemsize, return_attention):
    est = 0
    est += 2 * TQ * C * 4                      # xq block (double buffered)
    est += 2 * 2 * C * HW * 4                  # xkv per-batch block
    est += 2 * C * HW * 4 + 2 * C * HW * 4     # hz per-tile + hz per-batch blocks
    est += 2 * C * HW * 4                      # fused output block
    if return_attention:
        est += 2 * TQ * HW * attn_itemsize     # attention output block
    est += hid * HW * 2 + C * HW * 2           # bf16 K^T / V^T caches
    est += 6 * TQ * HW * 4                     # logits / softmax temporaries headroom
    est += 1 << 20                             # weights, biases, slack
    return int(min(96 * 1024 * 1024, max(32 * 1024 * 1024, 2 * est)))


def self_attention_forward(q, k, v, params, *, attn_dtype=jnp.bfloat16,
                           return_attention=True):
    """q, k, v: NCHW float32.  Returns (out NCHW, attention (B, HW, HW)) or just out."""
    B, C, H, W = q.shape
    HW = H * W
    hid = params["wq"].shape[0]
    if HW % C != 0:
        raise ValueError("kernel requires channels to divide H*W (torch .view semantics)")
    npc = HW // C          # pixels per "viewed" channel; also the query tile size
    if npc % 8 != 0:
        raise ValueError("H*W // C must be a multiple of 8")
    TQ = npc
    nQ = C
    f32 = jnp.float32
    attn_dtype = jnp.dtype(attn_dtype)

    # Q input pixel-major for a natural (TQ, C) @ (C, hid) projection per tile.
    xq = q.transpose(0, 2, 3, 1).reshape(B, HW, C).astype(f32)
    # K and V stay channel-major (free reshape of NCHW) and are stacked so the K / V
    # projections fuse into ONE matmul against a block-diagonal packed weight.
    xkv = jnp.concatenate([k.reshape(B, C, HW), v.reshape(B, C, HW)], axis=1).astype(f32)
    # Residual / gating tensor in the coordinates of torch's z.view(B, C, H, W):
    #   hz[b, c, cc, rr] = h[b, c, rr*C + cc]   (h == q, NCHW-flat).
    hz = q.reshape(B, C, npc, C).transpose(0, 1, 3, 2).astype(f32)

    wqT = params["wq"].T.astype(f32)                              # (C, hid)
    bq = params["bq"].reshape(1, hid).astype(f32)
    w_kv = jnp.zeros((hid + C, 2 * C), f32)
    w_kv = w_kv.at[:hid, :C].set(params["wk"].astype(f32))
    w_kv = w_kv.at[hid:, C:].set(params["wv"].astype(f32))       # block-diagonal [wk|wv]
    b_kv = jnp.concatenate([params["bk"], params["bv"]]).astype(f32).reshape(hid + C, 1)
    wf = params["wf"].astype(f32)                                 # (C, C) -> SMEM scalars
    bf = params["bf"].astype(f32)                                 # (C,)   -> SMEM scalars

    kernel = _make_kernel(C, hid, attn_dtype, return_attention)

    smem = pl.BlockSpec(memory_space=pltpu.MemorySpace.SMEM)
    full = lambda shape: pl.BlockSpec(shape, lambda b, qi, _s=shape: (0,) * len(_s))
    in_specs = [
        pl.BlockSpec((1, TQ, C), lambda b, qi: (b, qi, 0)),          # xq  (query tile)
        pl.BlockSpec((1, 2 * C, HW), lambda b, qi: (b, 0, 0)),       # xkv (per batch)
        pl.BlockSpec((1, 1, C, npc), lambda b, qi: (b, qi, 0, 0)),   # hz, this channel
        pl.BlockSpec((1, C, C, npc), lambda b, qi: (b, 0, 0, 0)),    # hz, full (init)
        full((C, hid)), full((1, hid)),                              # wqT, bq
        full((hid + C, 2 * C)), full((hid + C, 1)),                  # w_kv, b_kv
        smem, smem,                                                  # wf, bf
    ]

    out_spec_main = pl.BlockSpec((1, C, C, npc), lambda b, qi: (b, 0, 0, 0))
    out_shape_main = jax.ShapeDtypeStruct((B, C, C, npc), f32)
    if return_attention:
        out_shape = (out_shape_main, jax.ShapeDtypeStruct((B, HW, HW), attn_dtype))
        out_specs = (out_spec_main,
                     pl.BlockSpec((1, TQ, HW), lambda b, qi: (b, qi, 0)))
    else:
        out_shape = out_shape_main
        out_specs = out_spec_main

    vmem_limit = _vmem_limit_bytes(C, HW, hid, TQ, attn_dtype.itemsize, return_attention)

    result = pl.pallas_call(
        kernel,
        out_shape=out_shape,
        grid=(B, nQ),
        in_specs=in_specs,
        out_specs=out_specs,
        scratch_shapes=[pltpu.VMEM((hid, HW), jnp.bfloat16),   # cached K^T projection
                        pltpu.VMEM((C, HW), jnp.bfloat16)],    # cached V^T projection
        compiler_params=pltpu.CompilerParams(
            dimension_semantics=("parallel", "arbitrary"),
            vmem_limit_bytes=vmem_limit),
    )(xq, xkv, hz, hz, wqT, bq, w_kv, b_kv, wf, bf)

    if return_attention:
        out4, attn = result
    else:
        out4, attn = result, None

    # out4[b, o, cc, rr] == out_nchw[b, o, rr*C + cc]: swap the two tiny minor dims and
    # the contiguous reshape to NCHW is free.
    out = out4.transpose(0, 1, 3, 2).reshape(B, C, H, W)
    return (out, attn) if return_attention else out


# ----------------------------- Pure-JAX reference (for verification) ----------
def _ref_forward(q, k, v, params):
    B, C, H, W = q.shape
    HW = H * W

    def conv1x1(x, w, b):
        return jnp.einsum("bchw,oc->bohw", x, w) + b[None, :, None, None]

    h = q
    qp = conv1x1(q, params["wq"], params["bq"]).reshape(B, -1, HW).transpose(0, 2, 1)
    kp = conv1x1(k, params["wk"], params["bk"]).reshape(B, -1, HW)
    vp = conv1x1(v, params["wv"], params["bv"]).reshape(B, C, HW)
    e = jnp.einsum("bph,bhq->bpq", qp, kp)
    attn = jax.nn.softmax(e, axis=-1)
    z = jnp.einsum("bpq,bqc->bpc", attn, vp.transpose(0, 2, 1))
    z = z.reshape(B, C, H, W)                     # torch .view semantics
    out = conv1x1(z * h, params["wf"], params["bf"]) + h
    return out, attn


if __name__ == "__main__":
    B, C, H, W = 2, 4, 16, 16
    hidden = 32

    key = jax.random.PRNGKey(0)
    ks = jax.random.split(key, 12)

    # nn.Conv2d(., ., 1) weights with the trailing 1x1 spatial dims squeezed.
    params = {
        "wq": 0.1 * jax.random.normal(ks[0], (hidden, C), jnp.float32),
        "bq": 0.1 * jax.random.normal(ks[1], (hidden,), jnp.float32),
        "wk": 0.1 * jax.random.normal(ks[2], (hidden, C), jnp.float32),
        "bk": 0.1 * jax.random.normal(ks[3], (hidden,), jnp.float32),
        "wv": 0.1 * jax.random.normal(ks[4], (C, C), jnp.float32),
        "bv": 0.1 * jax.random.normal(ks[5], (C,), jnp.float32),
        "wf": 0.1 * jax.random.normal(ks[6], (C, C), jnp.float32),
        "bf": 0.1 * jax.random.normal(ks[7], (C,), jnp.float32),
    }

    q = jax.random.normal(ks[8], (B, C, H, W), jnp.float32)
    k = jax.random.normal(ks[9], (B, C, H, W), jnp.float32)
    v = jax.random.normal(ks[10], (B, C, H, W), jnp.float32)

    out, attn = self_attention_forward(q, k, v, params)
    out = jax.block_until_ready(out)
    attn = jax.block_until_ready(attn)

    out_ref, attn_ref = _ref_forward(q, k, v, params)
    # bf16 MXU inputs, bf16 attention output and approx reciprocal -> relaxed tolerances.
    assert jnp.allclose(out, out_ref, rtol=2e-2, atol=2e-2), \
        float(jnp.max(jnp.abs(out - out_ref)))
    assert jnp.allclose(attn.astype(jnp.float32), attn_ref, rtol=5e-2, atol=1e-3), \
        float(jnp.max(jnp.abs(attn.astype(jnp.float32) - attn_ref)))

    # Also exercise the attention-free fast path (drops the O(HW^2) writeback entirely).
    out_only = jax.block_until_ready(
        self_attention_forward(q, k, v, params, return_attention=False))
    assert jnp.allclose(out_only, out_ref, rtol=2e-2, atol=2e-2), \
        float(jnp.max(jnp.abs(out_only - out_ref)))

    print("KERNEL_OK")
</pallas_src>

<mosaic_0001>
module attributes {stable_mosaic.version = 11 : i64} {
  func.func @kernel(%arg0: i32, %arg1: i32, %arg2: memref<1x64x4xf32, #tpu.memory_space<vmem>>, %arg3: memref<1x8x256xf32, #tpu.memory_space<vmem>>, %arg4: memref<1x1x4x64xf32, #tpu.memory_space<vmem>>, %arg5: memref<1x4x4x64xf32, #tpu.memory_space<vmem>>, %arg6: memref<4x32xf32, #tpu.memory_space<vmem>>, %arg7: memref<1x32xf32, #tpu.memory_space<vmem>>, %arg8: memref<36x8xf32, #tpu.memory_space<vmem>>, %arg9: memref<36x1xf32, #tpu.memory_space<vmem>>, %arg10: memref<4x4xf32, #tpu.memory_space<smem>>, %arg11: memref<4xf32, #tpu.memory_space<smem>>, %arg12: memref<1x4x4x64xf32, #tpu.memory_space<vmem>>, %arg13: memref<1x64x256xbf16, #tpu.memory_space<vmem>>, %arg14: memref<32x256xbf16, #tpu.memory_space<vmem>>, %arg15: memref<4x256xbf16, #tpu.memory_space<vmem>>) attributes {dimension_semantics = [#tpu.dimension_semantics<parallel>, #tpu.dimension_semantics<arbitrary>], iteration_bounds = array<i64: 2, 4>, scalar_prefetch = 0 : i64, scratch_operands = 2 : i64, tpu.core_type = #tpu.core_type<tc>, window_params = [{transform_indices = @transform_0, window_bounds = array<i64: 1, 64, 4>}, {transform_indices = @transform_1, window_bounds = array<i64: 1, 8, 256>}, {transform_indices = @transform_2, window_bounds = array<i64: 1, 1, 4, 64>}, {transform_indices = @transform_3, window_bounds = array<i64: 1, 4, 4, 64>}, {pipeline_mode = #tpu.pipeline_mode<synchronous>, transform_indices = @transform_4, window_bounds = array<i64: 4, 32>}, {pipeline_mode = #tpu.pipeline_mode<synchronous>, transform_indices = @transform_5, window_bounds = array<i64: 1, 32>}, {pipeline_mode = #tpu.pipeline_mode<synchronous>, transform_indices = @transform_6, window_bounds = array<i64: 36, 8>}, {pipeline_mode = #tpu.pipeline_mode<synchronous>, transform_indices = @transform_7, window_bounds = array<i64: 36, 1>}, {transform_indices = @transform_8, window_bounds = array<i64: 4, 4>}, {transform_indices = @transform_9, window_bounds = array<i64: 4>}, {transform_indices = @transform_10, window_bounds = array<i64: 1, 4, 4, 64>}, {transform_indices = @transform_11, window_bounds = array<i64: 1, 64, 256>}]} {
    %c0_i32 = arith.constant 0 : i32
    %0 = arith.cmpi eq, %arg1, %c0_i32 : i32
    %1 = arith.extui %0 : i1 to i32
    %c0_i32_0 = arith.constant 0 : i32
    %2 = arith.cmpi ne, %1, %c0_i32_0 : i32
    scf.if %2 {
      %c0_55 = arith.constant 0 : index
      %c0_56 = arith.constant 0 : index
      %72 = vector.load %arg8[%c0_55, %c0_56] : memref<36x8xf32, #tpu.memory_space<vmem>>, vector<36x8xf32>
      %c0_57 = arith.constant 0 : index
      %c0_58 = arith.constant 0 : index
      %c0_59 = arith.constant 0 : index
      %73 = vector.load %arg3[%c0_57, %c0_58, %c0_59] : memref<1x8x256xf32, #tpu.memory_space<vmem>>, vector<1x8x256xf32>
      %74 = vector.shape_cast %73 : vector<1x8x256xf32> to vector<8x256xf32>
      %cst_60 = arith.constant dense<0.000000e+00> : vector<36x256xf32>
      %75 = tpu.matmul %72, %74, %cst_60 {dimension_numbers = #tpu.dot_dimension_numbers<[1], [0], [0], [1], [0, 0, 1, 1], [], []>} : vector<36x8xf32>, vector<8x256xf32>, vector<36x256xf32> -> vector<36x256xf32>
      %c0_61 = arith.constant 0 : index
      %c0_62 = arith.constant 0 : index
      %76 = vector.load %arg9[%c0_61, %c0_62] : memref<36x1xf32, #tpu.memory_space<vmem>>, vector<36x1xf32>
      %77 = vector.broadcast %76 : vector<36x1xf32> to vector<36x256xf32>
      %78 = arith.addf %75, %77 : vector<36x256xf32>
      %79 = vector.extract_strided_slice %78 {offsets = [0, 0], sizes = [32, 256], strides = [1, 1]} : vector<36x256xf32> to vector<32x256xf32>
      %80 = arith.truncf %79 : vector<32x256xf32> to vector<32x256xbf16>
      %c0_63 = arith.constant 0 : index
      %c0_64 = arith.constant 0 : index
      %81 = vector.load %arg14[%c0_63, %c0_64] : memref<32x256xbf16, #tpu.memory_space<vmem>>, vector<32x256xbf16>
      tpu.vector_store %arg14[%c0_63, %c0_64], %80 {strides = array<i32>} : memref<32x256xbf16, #tpu.memory_space<vmem>>, vector<32x256xbf16>,
      %82 = vector.extract_strided_slice %78 {offsets = [32, 0], sizes = [4, 256], strides = [1, 1]} : vector<36x256xf32> to vector<4x256xf32>
      %83 = arith.truncf %82 : vector<4x256xf32> to vector<4x256xbf16>
      %c0_65 = arith.constant 0 : index
      %c0_66 = arith.constant 0 : index
      %84 = vector.load %arg15[%c0_65, %c0_66] : memref<4x256xbf16, #tpu.memory_space<vmem>>, vector<4x256xbf16>
      tpu.vector_store %arg15[%c0_65, %c0_66], %83 {strides = array<i32>} : memref<4x256xbf16, #tpu.memory_space<vmem>>, vector<4x256xbf16>,
      %c0_67 = arith.constant 0 : index
      %c0_68 = arith.constant 0 : index
      %c0_69 = arith.constant 0 : index
      %c0_70 = arith.constant 0 : index
      %85 = vector.load %arg5[%c0_67, %c0_68, %c0_69, %c0_70] : memref<1x4x4x64xf32, #tpu.memory_space<vmem>>, vector<1x1x4x64xf32>
      %86 = vector.shape_cast %85 : vector<1x1x4x64xf32> to vector<4x64xf32>
      %c0_71 = arith.constant 0 : index
      %87 = memref.load %arg11[%c0_71] : memref<4xf32, #tpu.memory_space<smem>>
      %88 = vector.broadcast %87 : f32 to vector<4x64xf32>
      %89 = arith.addf %86, %88 : vector<4x64xf32>
      %c0_72 = arith.constant 0 : index
      %c0_73 = arith.constant 0 : index
      %c0_74 = arith.constant 0 : index
      %c0_75 = arith.constant 0 : index
      %90 = vector.load %arg12[%c0_72, %c0_73, %c0_74, %c0_75] : memref<1x4x4x64xf32, #tpu.memory_space<vmem>>, vector<1x1x4x64xf32>
      %91 = vector.shape_cast %90 : vector<1x1x4x64xf32> to vector<4x64xf32>
      %92 = vector.shape_cast %89 : vector<4x64xf32> to vector<1x1x4x64xf32>
      tpu.vector_store %arg12[%c0_72, %c0_73, %c0_74, %c0_75], %92 {strides = array<i32>} : memref<1x4x4x64xf32, #tpu.memory_space<vmem>>, vector<1x1x4x64xf32>,
      %c0_76 = arith.constant 0 : index
      %c1_77 = arith.constant 1 : index
      %c0_78 = arith.constant 0 : index
      %c0_79 = arith.constant 0 : index
      %93 = vector.load %arg5[%c0_76, %c1_77, %c0_78, %c0_79] : memref<1x4x4x64xf32, #tpu.memory_space<vmem>>, vector<1x1x4x64xf32>
      %94 = vector.shape_cast %93 : vector<1x1x4x64xf32> to vector<4x64xf32>
      %c1_80 = arith.constant 1 : index
      %95 = memref.load %arg11[%c1_80] : memref<4xf32, #tpu.memory_space<smem>>
      %96 = vector.broadcast %95 : f32 to vector<4x64xf32>
      %97 = arith.addf %94, %96 : vector<4x64xf32>
      %c0_81 = arith.constant 0 : index
      %c1_82 = arith.constant 1 : index
      %c0_83 = arith.constant 0 : index
      %c0_84 = arith.constant 0 : index
      %98 = vector.load %arg12[%c0_81, %c1_82, %c0_83, %c0_84] : memref<1x4x4x64xf32, #tpu.memory_space<vmem>>, vector<1x1x4x64xf32>
      %99 = vector.shape_cast %98 : vector<1x1x4x64xf32> to vector<4x64xf32>
      %100 = vector.shape_cast %97 : vector<4x64xf32> to vector<1x1x4x64xf32>
      tpu.vector_store %arg12[%c0_81, %c1_82, %c0_83, %c0_84], %100 {strides = array<i32>} : memref<1x4x4x64xf32, #tpu.memory_space<vmem>>, vector<1x1x4x64xf32>,
      %c0_85 = arith.constant 0 : index
      %c2_86 = arith.constant 2 : index
      %c0_87 = arith.constant 0 : index
      %c0_88 = arith.constant 0 : index
      %101 = vector.load %arg5[%c0_85, %c2_86, %c0_87, %c0_88] : memref<1x4x4x64xf32, #tpu.memory_space<vmem>>, vector<1x1x4x64xf32>
      %102 = vector.shape_cast %101 : vector<1x1x4x64xf32> to vector<4x64xf32>
      %c2_89 = arith.constant 2 : index
      %103 = memref.load %arg11[%c2_89] : memref<4xf32, #tpu.memory_space<smem>>
      %104 = vector.broadcast %103 : f32 to vector<4x64xf32>
      %105 = arith.addf %102, %104 : vector<4x64xf32>
      %c0_90 = arith.constant 0 : index
      %c2_91 = arith.constant 2 : index
      %c0_92 = arith.constant 0 : index
      %c0_93 = arith.constant 0 : index
      %106 = vector.load %arg12[%c0_90, %c2_91, %c0_92, %c0_93] : memref<1x4x4x64xf32, #tpu.memory_space<vmem>>, vector<1x1x4x64xf32>
      %107 = vector.shape_cast %106 : vector<1x1x4x64xf32> to vector<4x64xf32>
      %108 = vector.shape_cast %105 : vector<4x64xf32> to vector<1x1x4x64xf32>
      tpu.vector_store %arg12[%c0_90, %c2_91, %c0_92, %c0_93], %108 {strides = array<i32>} : memref<1x4x4x64xf32, #tpu.memory_space<vmem>>, vector<1x1x4x64xf32>,
      %c0_94 = arith.constant 0 : index
      %c3_95 = arith.constant 3 : index
      %c0_96 = arith.constant 0 : index
      %c0_97 = arith.constant 0 : index
      %109 = vector.load %arg5[%c0_94, %c3_95, %c0_96, %c0_97] : memref<1x4x4x64xf32, #tpu.memory_space<vmem>>, vector<1x1x4x64xf32>
      %110 = vector.shape_cast %109 : vector<1x1x4x64xf32> to vector<4x64xf32>
      %c3_98 = arith.constant 3 : index
      %111 = memref.load %arg11[%c3_98] : memref<4xf32, #tpu.memory_space<smem>>
      %112 = vector.broadcast %111 : f32 to vector<4x64xf32>
      %113 = arith.addf %110, %112 : vector<4x64xf32>
      %c0_99 = arith.constant 0 : index
      %c3_100 = arith.constant 3 : index
      %c0_101 = arith.constant 0 : index
      %c0_102 = arith.constant 0 : index
      %114 = vector.load %arg12[%c0_99, %c3_100, %c0_101, %c0_102] : memref<1x4x4x64xf32, #tpu.memory_space<vmem>>, vector<1x1x4x64xf32>
      %115 = vector.shape_cast %114 : vector<1x1x4x64xf32> to vector<4x64xf32>
      %116 = vector.shape_cast %113 : vector<4x64xf32> to vector<1x1x4x64xf32>
      tpu.vector_store %arg12[%c0_99, %c3_100, %c0_101, %c0_102], %116 {strides = array<i32>} : memref<1x4x4x64xf32, #tpu.memory_space<vmem>>, vector<1x1x4x64xf32>,
    } else {
    }
    %c0 = arith.constant 0 : index
    %c0_1 = arith.constant 0 : index
    %c0_2 = arith.constant 0 : index
    %3 = vector.load %arg2[%c0, %c0_1, %c0_2] : memref<1x64x4xf32, #tpu.memory_space<vmem>>, vector<1x64x4xf32>
    %4 = vector.shape_cast %3 : vector<1x64x4xf32> to vector<64x4xf32>
    %c0_3 = arith.constant 0 : index
    %c0_4 = arith.constant 0 : index
    %5 = vector.load %arg6[%c0_3, %c0_4] : memref<4x32xf32, #tpu.memory_space<vmem>>, vector<4x32xf32>
    %cst = arith.constant dense<0.000000e+00> : vector<64x32xf32>
    %6 = tpu.matmul %4, %5, %cst {dimension_numbers = #tpu.dot_dimension_numbers<[1], [0], [0], [1], [0, 0, 1, 1], [], []>} : vector<64x4xf32>, vector<4x32xf32>, vector<64x32xf32> -> vector<64x32xf32>
    %c0_5 = arith.constant 0 : index
    %c0_6 = arith.constant 0 : index
    %7 = vector.load %arg7[%c0_5, %c0_6] : memref<1x32xf32, #tpu.memory_space<vmem>>, vector<1x32xf32>
    %8 = vector.broadcast %7 : vector<1x32xf32> to vector<64x32xf32>
    %9 = arith.addf %6, %8 : vector<64x32xf32>
    %10 = arith.truncf %9 : vector<64x32xf32> to vector<64x32xbf16>
    %c0_7 = arith.constant 0 : index
    %c0_8 = arith.constant 0 : index
    %11 = vector.load %arg14[%c0_7, %c0_8] : memref<32x256xbf16, #tpu.memory_space<vmem>>, vector<32x256xbf16>
    %cst_9 = arith.constant dense<0.000000e+00> : vector<64x256xf32>
    %12 = tpu.matmul %10, %11, %cst_9 {dimension_numbers = #tpu.dot_dimension_numbers<[1], [0], [0], [1], [0, 0, 1, 1], [], []>} : vector<64x32xbf16>, vector<32x256xbf16>, vector<64x256xf32> -> vector<64x256xf32>
    %cst_10 = arith.constant dense<0xFF800000> : vector<64xf32>
    %13 = vector.multi_reduction <maximumf>, %12, %cst_10 [1] : vector<64x256xf32> to vector<64xf32>
    %14 = vector.shape_cast %13 : vector<64xf32> to vector<64x1xf32>
    %15 = vector.broadcast %14 : vector<64x1xf32> to vector<64x256xf32>
    %16 = arith.subf %12, %15 : vector<64x256xf32>
    %17 = math.exp %16 : vector<64x256xf32>
    %cst_11 = arith.constant dense<0.000000e+00> : vector<64xf32>
    %18 = vector.multi_reduction <add>, %17, %cst_11 [1] : vector<64x256xf32> to vector<64xf32>
    %19 = vector.shape_cast %18 : vector<64xf32> to vector<64x1xf32>
    %20 = tpu.reciprocal %19 {approx = true} : vector<64x1xf32> -> vector<64x1xf32>
    %21 = vector.broadcast %20 : vector<64x1xf32> to vector<64x256xf32>
    %22 = arith.mulf %17, %21 : vector<64x256xf32>
    %23 = arith.truncf %22 : vector<64x256xf32> to vector<64x256xbf16>
    %c0_12 = arith.constant 0 : index
    %c0_13 = arith.constant 0 : index
    %c0_14 = arith.constant 0 : index
    %24 = vector.load %arg13[%c0_12, %c0_13, %c0_14] : memref<1x64x256xbf16, #tpu.memory_space<vmem>>, vector<1x64x256xbf16>
    %25 = vector.shape_cast %24 : vector<1x64x256xbf16> to vector<64x256xbf16>
    %26 = vector.shape_cast %23 : vector<64x256xbf16> to vector<1x64x256xbf16>
    tpu.vector_store %arg13[%c0_12, %c0_13, %c0_14], %26 {strides = array<i32>} : memref<1x64x256xbf16, #tpu.memory_space<vmem>>, vector<1x64x256xbf16>,
    %c0_15 = arith.constant 0 : index
    %c0_16 = arith.constant 0 : index
    %27 = vector.load %arg15[%c0_15, %c0_16] : memref<4x256xbf16, #tpu.memory_space<vmem>>, vector<4x256xbf16>
    %cst_17 = arith.constant dense<0.000000e+00> : vector<4x64xf32>
    %28 = tpu.matmul %27, %23, %cst_17 {dimension_numbers = #tpu.dot_dimension_numbers<[1], [1], [0], [0], [0, 0, 1, 0], [], []>} : vector<4x256xbf16>, vector<64x256xbf16>, vector<4x64xf32> -> vector<4x64xf32>
    %c0_18 = arith.constant 0 : index
    %c0_19 = arith.constant 0 : index
    %c0_20 = arith.constant 0 : index
    %c0_21 = arith.constant 0 : index
    %29 = vector.load %arg4[%c0_18, %c0_19, %c0_20, %c0_21] : memref<1x1x4x64xf32, #tpu.memory_space<vmem>>, vector<1x1x4x64xf32>
    %30 = vector.shape_cast %29 : vector<1x1x4x64xf32> to vector<4x64xf32>
    %31 = arith.mulf %28, %30 : vector<4x64xf32>
    %c0_22 = arith.constant 0 : index
    %c0_23 = arith.constant 0 : index
    %c0_24 = arith.constant 0 : index
    %c0_25 = arith.constant 0 : index
    %32 = vector.load %arg12[%c0_22, %c0_23, %c0_24, %c0_25] : memref<1x4x4x64xf32, #tpu.memory_space<vmem>>, vector<1x1x4x64xf32>
    %33 = vector.shape_cast %32 : vector<1x1x4x64xf32> to vector<4x64xf32>
    %c0_26 = arith.constant 0 : index
    %34 = arith.index_cast %arg1 : i32 to index
    %35 = memref.load %arg10[%c0_26, %34] : memref<4x4xf32, #tpu.memory_space<smem>>
    %36 = vector.broadcast %35 : f32 to vector<4x64xf32>
    %37 = arith.mulf %36, %31 : vector<4x64xf32>
    %38 = arith.addf %33, %37 : vector<4x64xf32>
    %c0_27 = arith.constant 0 : index
    %c0_28 = arith.constant 0 : index
    %c0_29 = arith.constant 0 : index
    %c0_30 = arith.constant 0 : index
    %39 = vector.load %arg12[%c0_27, %c0_28, %c0_29, %c0_30] : memref<1x4x4x64xf32, #tpu.memory_space<vmem>>, vector<1x1x4x64xf32>
    %40 = vector.shape_cast %39 : vector<1x1x4x64xf32> to vector<4x64xf32>
    %41 = vector.shape_cast %38 : vector<4x64xf32> to vector<1x1x4x64xf32>
    tpu.vector_store %arg12[%c0_27, %c0_28, %c0_29, %c0_30], %41 {strides = array<i32>} : memref<1x4x4x64xf32, #tpu.memory_space<vmem>>, vector<1x1x4x64xf32>,
    %c0_31 = arith.constant 0 : index
    %c1 = arith.constant 1 : index
    %c0_32 = arith.constant 0 : index
    %c0_33 = arith.constant 0 : index
    %42 = vector.load %arg12[%c0_31, %c1, %c0_32, %c0_33] : memref<1x4x4x64xf32, #tpu.memory_space<vmem>>, vector<1x1x4x64xf32>
    %43 = vector.shape_cast %42 : vector<1x1x4x64xf32> to vector<4x64xf32>
    %c1_34 = arith.constant 1 : index
    %44 = arith.index_cast %arg1 : i32 to index
    %45 = memref.load %arg10[%c1_34, %44] : memref<4x4xf32, #tpu.memory_space<smem>>
    %46 = vector.broadcast %45 : f32 to vector<4x64xf32>
    %47 = arith.mulf %46, %31 : vector<4x64xf32>
    %48 = arith.addf %43, %47 : vector<4x64xf32>
    %c0_35 = arith.constant 0 : index
    %c1_36 = arith.constant 1 : index
    %c0_37 = arith.constant 0 : index
    %c0_38 = arith.constant 0 : index
    %49 = vector.load %arg12[%c0_35, %c1_36, %c0_37, %c0_38] : memref<1x4x4x64xf32, #tpu.memory_space<vmem>>, vector<1x1x4x64xf32>
    %50 = vector.shape_cast %49 : vector<1x1x4x64xf32> to vector<4x64xf32>
    %51 = vector.shape_cast %48 : vector<4x64xf32> to vector<1x1x4x64xf32>
    tpu.vector_store %arg12[%c0_35, %c1_36, %c0_37, %c0_38], %51 {strides = array<i32>} : memref<1x4x4x64xf32, #tpu.memory_space<vmem>>, vector<1x1x4x64xf32>,
    %c0_39 = arith.constant 0 : index
    %c2 = arith.constant 2 : index
    %c0_40 = arith.constant 0 : index
    %c0_41 = arith.constant 0 : index
    %52 = vector.load %arg12[%c0_39, %c2, %c0_40, %c0_41] : memref<1x4x4x64xf32, #tpu.memory_space<vmem>>, vector<1x1x4x64xf32>
    %53 = vector.shape_cast %52 : vector<1x1x4x64xf32> to vector<4x64xf32>
    %c2_42 = arith.constant 2 : index
    %54 = arith.index_cast %arg1 : i32 to index
    %55 = memref.load %arg10[%c2_42, %54] : memref<4x4xf32, #tpu.memory_space<smem>>
    %56 = vector.broadcast %55 : f32 to vector<4x64xf32>
    %57 = arith.mulf %56, %31 : vector<4x64xf32>
    %58 = arith.addf %53, %57 : vector<4x64xf32>
    %c0_43 = arith.constant 0 : index
    %c2_44 = arith.constant 2 : index
    %c0_45 = arith.constant 0 : index
    %c0_46 = arith.constant 0 : index
    %59 = vector.load %arg12[%c0_43, %c2_44, %c0_45, %c0_46] : memref<1x4x4x64xf32, #tpu.memory_space<vmem>>, vector<1x1x4x64xf32>
    %60 = vector.shape_cast %59 : vector<1x1x4x64xf32> to vector<4x64xf32>
    %61 = vector.shape_cast %58 : vector<4x64xf32> to vector<1x1x4x64xf32>
    tpu.vector_store %arg12[%c0_43, %c2_44, %c0_45, %c0_46], %61 {strides = array<i32>} : memref<1x4x4x64xf32, #tpu.memory_space<vmem>>, vector<1x1x4x64xf32>,
    %c0_47 = arith.constant 0 : index
    %c3 = arith.constant 3 : index
    %c0_48 = arith.constant 0 : index
    %c0_49 = arith.constant 0 : index
    %62 = vector.load %arg12[%c0_47, %c3, %c0_48, %c0_49] : memref<1x4x4x64xf32, #tpu.memory_space<vmem>>, vector<1x1x4x64xf32>
    %63 = vector.shape_cast %62 : vector<1x1x4x64xf32> to vector<4x64xf32>
    %c3_50 = arith.constant 3 : index
    %64 = arith.index_cast %arg1 : i32 to index
    %65 = memref.load %arg10[%c3_50, %64] : memref<4x4xf32, #tpu.memory_space<smem>>
    %66 = vector.broadcast %65 : f32 to vector<4x64xf32>
    %67 = arith.mulf %66, %31 : vector<4x64xf32>
    %68 = arith.addf %63, %67 : vector<4x64xf32>
    %c0_51 = arith.constant 0 : index
    %c3_52 = arith.constant 3 : index
    %c0_53 = arith.constant 0 : index
    %c0_54 = arith.constant 0 : index
    %69 = vector.load %arg12[%c0_51, %c3_52, %c0_53, %c0_54] : memref<1x4x4x64xf32, #tpu.memory_space<vmem>>, vector<1x1x4x64xf32>
    %70 = vector.shape_cast %69 : vector<1x1x4x64xf32> to vector<4x64xf32>
    %71 = vector.shape_cast %68 : vector<4x64xf32> to vector<1x1x4x64xf32>
    tpu.vector_store %arg12[%c0_51, %c3_52, %c0_53, %c0_54], %71 {strides = array<i32>} : memref<1x4x4x64xf32, #tpu.memory_space<vmem>>, vector<1x1x4x64xf32>,
    return
  }
  func.func @transform_0(%arg0: i32, %arg1: i32) -> (i32, i32, i32) {
    %c0_i32 = arith.constant 0 : i32
    %c0_i32_0 = arith.constant 0 : i32
    return %arg0, %arg1, %c0_i32 : i32, i32, i32
  }
  func.func @transform_1(%arg0: i32, %arg1: i32) -> (i32, i32, i32) {
    %c0_i32 = arith.constant 0 : i32
    %c0_i32_0 = arith.constant 0 : i32
    %c0_i32_1 = arith.constant 0 : i32
    return %arg0, %c0_i32, %c0_i32_0 : i32, i32, i32
  }
  func.func @transform_2(%arg0: i32, %arg1: i32) -> (i32, i32, i32, i32) {
    %c0_i32 = arith.constant 0 : i32
    %c0_i32_0 = arith.constant 0 : i32
    %c0_i32_1 = arith.constant 0 : i32
    return %arg0, %arg1, %c0_i32, %c0_i32_0 : i32, i32, i32, i32
  }
  func.func @transform_3(%arg0: i32, %arg1: i32) -> (i32, i32, i32, i32) {
    %c0_i32 = arith.constant 0 : i32
    %c0_i32_0 = arith.constant 0 : i32
    %c0_i32_1 = arith.constant 0 : i32
    %c0_i32_2 = arith.constant 0 : i32
    return %arg0, %c0_i32, %c0_i32_0, %c0_i32_1 : i32, i32, i32, i32
  }
  func.func @transform_4(%arg0: i32, %arg1: i32) -> (i32, i32) {
    %c0_i32 = arith.constant 0 : i32
    %c0_i32_0 = arith.constant 0 : i32
    %c0_i32_1 = arith.constant 0 : i32
    return %c0_i32, %c0_i32_0 : i32, i32
  }
  func.func @transform_5(%arg0: i32, %arg1: i32) -> (i32, i32) {
    %c0_i32 = arith.constant 0 : i32
    %c0_i32_0 = arith.constant 0 : i32
    %c0_i32_1 = arith.constant 0 : i32
    return %c0_i32, %c0_i32_0 : i32, i32
  }
  func.func @transform_6(%arg0: i32, %arg1: i32) -> (i32, i32) {
    %c0_i32 = arith.constant 0 : i32
    %c0_i32_0 = arith.constant 0 : i32
    %c0_i32_1 = arith.constant 0 : i32
    return %c0_i32, %c0_i32_0 : i32, i32
  }
  func.func @transform_7(%arg0: i32, %arg1: i32) -> (i32, i32) {
    %c0_i32 = arith.constant 0 : i32
    %c0_i32_0 = arith.constant 0 : i32
    %c0_i32_1 = arith.constant 0 : i32
    return %c0_i32, %c0_i32_0 : i32, i32
  }
  func.func @transform_8(%arg0: i32, %arg1: i32) -> (i32, i32) {
    %c0_i32 = arith.constant 0 : i32
    %c0_i32_0 = arith.constant 0 : i32
    %c0_i32_1 = arith.constant 0 : i32
    return %c0_i32, %c0_i32_0 : i32, i32
  }
  func.func @transform_9(%arg0: i32, %arg1: i32) -> i32 {
    %c0_i32 = arith.constant 0 : i32
    %c0_i32_0 = arith.constant 0 : i32
    return %c0_i32 : i32
  }
  func.func @transform_10(%arg0: i32, %arg1: i32) -> (i32, i32, i32, i32) {
    %c0_i32 = arith.constant 0 : i32
    %c0_i32_0 = arith.constant 0 : i32
    %c0_i32_1 = arith.constant 0 : i32
    %c0_i32_2 = arith.constant 0 : i32
    return %arg0, %c0_i32, %c0_i32_0, %c0_i32_1 : i32, i32, i32, i32
  }
  func.func @transform_11(%arg0: i32, %arg1: i32) -> (i32, i32, i32) {
    %c0_i32 = arith.constant 0 : i32
    %c0_i32_0 = arith.constant 0 : i32
    return %arg0, %arg1, %c0_i32 : i32, i32, i32
  }
}

</mosaic_0001>

<bundles_post_ra>
// kernel: tpu_custom_call.1
= control target key start
LH: loop header
LB: loop body
LE: loop exit
PB: predicated region body
PF: predicated region fallthrough
CT: control target
= control target key end

     0   :  { %s2534_s0 = inlined_call_operand.vmem [shape: f32[2,256,4], index: 0, kind: input, shape index: {}]   ;;  %s2535_s1 = inlined_call_operand.vmem [shape: f32[2,8,256], index: 1, kind: input, shape index: {}]   ;;  %s2536_s2 = inlined_call_operand.vmem [shape: f32[2,4,4,64], index: 2, kind: input, shape index: {}]   ;;  %s2537_s3 = inlined_call_operand.vmem [shape: f32[2,4,4,64], index: 3, kind: input, shape index: {}]   ;;  %s2538_s4 = inlined_call_operand.vmem [shape: f32[4,32], index: 4, kind: input, shape index: {}]   ;;  %s2539_s5 = inlined_call_operand.vmem [shape: f32[1,32], index: 5, kind: input, shape index: {}]   ;;  %s2540_s6 = inlined_call_operand.vmem [shape: f32[36,8], index: 6, kind: input, shape index: {}]   ;;  %s2541_s7 = inlined_call_operand.vmem [shape: f32[36,1], index: 7, kind: input, shape index: {}]   ;;  %s2542_s8 = inlined_call_operand.vmem [shape: f32[4,4], index: 8, kind: input, shape index: {}]   ;;  %s2543_s9 = inlined_call_operand.vmem [shape: f32[4], index: 9, kind: input, shape index: {}]   ;;  %s2544_s10 = inlined_call_operand.hbm [shape: f32[2,4,4,64], index: 10, kind: output, shape index: {0}]   ;;  %s2545_s11 = inlined_call_operand.hbm [shape: bf16[2,256,256], index: 11, kind: output, shape index: {1}]  }
   0x1   :  { %2573 = sst [smem:[#allocation32_spill]] %s2539_s5 }
   0x2   :  { %2574 = sst [smem:[#allocation33_spill]] %s2542_s8 }
   0x3   :  { %2575 = sst [smem:[#allocation34_spill]] %s2543_s9 }
   0x4   :  { %2576 = sst [smem:[#allocation35_spill]] %s2544_s10 }
   0x5   :  { %2577 = sst [smem:[#allocation36_spill]] %s2545_s11 }
   0x6   :  { %17 = vsyncpa [#allocation6], 0 }
   0x7   :  { %18 = vsyncpa [#allocation8], 0 }
   0x8   :  { %19 = vsyncpa [#allocation5], 0 }
   0x9   :  { %21 = vsyncpa [#allocation5 + $0x1], 0 }
   0xa   :  { %22 = vsyncpa [#allocation11], 0 }
   0xb   :  { %24 = vsyncpa [#allocation11 + $0x1], 0  ;;  %s2073_s17 = smov 0   ;;  %s2075_s18 = smov 0  }
   0xc   :  { %s2077_s19 = smov 0   ;;  %s2079_s20 = smov 0  }
   0xd   :  { %s2081_s21 = smov 0   ;;  %s2083_s22 = smov 0  }
   0xe   :  { %s2085_s23 = smov 0   ;;  %s2087_s24 = smov 0  }
   0xf   :  { %s2089_s25 = smov 0   ;;  %s2091_s26 = smov 0  }
  0x10   :  { %s2093_s27 = smov 0  }
  0x11 LB: > { %2578 = sst [smem:[#allocation16_spill]] %s1960_s17  ;;  %s2546_s28 = sadd.s32 4294967295, %s2000_s27   ;;  %s2000_s27 = sphi %s2093_s27, %s30_s27   ;;  %s1996_s26 = sphi %s2091_s26, %s2635_s26   ;;  %s1992_s25 = sphi %s2089_s25, %s2634_s25   ;;  %s1988_s24 = sphi %s2087_s24, %s2633_s24   ;;  %s1984_s23 = sphi %s2085_s23, %s2632_s23   ;;  %s1980_s22 = sphi %s2083_s22, %s2631_s22   ;;  %s1976_s21 = sphi %s2081_s21, %s2630_s21   ;;  %s1972_s20 = sphi %s2079_s20, %s2629_s20   ;;  %s1968_s19 = sphi %s2077_s19, %s2628_s19   ;;  %s1964_s18 = sphi %s2075_s18, %s2637_s18   ;;  %s1960_s17 = sphi %s2073_s17, %s2636_s17  }
  0x12   : > { %2579 = sst [smem:[#allocation17_spill]] %s1968_s19  ;;  %s1499_s29 = sadd.s32 4294967294, %s2000_s27  }
  0x13   : > { %2580 = sst [smem:[#allocation18_spill]] %s1972_s20  ;;  %s39_s30 = sadd.s32 1, %s1992_s25 }
  0x14   : > { %2581 = sst [smem:[#allocation19_spill]] %s1976_s21  ;;  %s42_s12 = sadd.s32 1, %s1996_s26 }
  0x15   : > { %2582 = sst [smem:[#allocation20_spill]] %s1980_s22  ;;  %p40_p0 = scmp.ge.s32.totalorder %s39_s30, 4 }
  0x16   : > { %2583 = sst [smem:[#allocation21_spill]] %s1992_s25  ;;  %s283_s13 = sadd.s32 1, %s1980_s22 }
  0x17   : > { %2584 = sst [smem:[#allocation22_spill]] %s1996_s26  ;;  %p293_p1 = scmp.ne.s32.totalorder %s1980_s22, %s1976_s21 }
  0x18   : > { %2585 = sst [smem:[#allocation23_spill]] %s2000_s27  ;;  %p2137_p2 = scmp.eq.s32.totalorder %s2546_s28, 7 }
  0x19   : > { %s2639_s30 = smov (%p40_p0, %s39_s30), 0  ;;  %s2641_s12 = smov (!%p40_p0, %s42_s12), %s1996_s26 }
  0x1a   : > { %2587 = sst [smem:[#allocation24_spill]] %s2639_s30  ;;  %p2146_p3 = por %p2137_p2, %p293_p1 }
  0x1b   : > { %p299_p4 = scmp.ne.s32.totalorder %s1976_s21, %s1972_s20  ;;  %p44_p5 = scmp.ge.s32.totalorder %s2641_s12, 2 }
  0x1c   : > { %s2588_s15 = scalar_select %p2146_p3, 1, 0 }
  0x1d   : > { %p2152_p6 = scmp.eq.s32.totalorder %s1499_s29, 7  ;;  %s307_s28 = ssub.s32 %s1992_s25, %s2639_s30 }
  0x1e   : > { %2589 = sst [smem:[#allocation25_spill]] %s2588_s15  ;;  %s311_s10 = sadd.s32 1, %s1968_s19 }
  0x1f   : > { %s2643_s12 = smov (%p44_p5, %s2641_s12), 0  ;;  %p2163_p7 = por %p2152_p6, %p299_p4 }
  0x20   : > { %2591 = sst [smem:[#allocation26_spill]] %s2643_s12  ;;  %p321_p8 = scmp.ne.s32.totalorder %s1968_s19, %s1964_s18 }
  0x21   : > { %s2592_s15 = scalar_select %p2163_p7, 1, 0 }
  0x22   : > { %s280_s20 = ssub.s32 %s1996_s26, %s2643_s12  ;;  %p327_p9 = scmp.ne.s32.totalorder %s1964_s18, %s1960_s17 }
  0x23   : > { %2593 = sst [smem:[#allocation27_spill]] %s2592_s15  ;;  %p281_p10 = scmp.eq.s32.totalorder %s280_s20, 0 }
  0x24   : > { %s308_s29 = sor.u32 %s307_s28, %s280_s20  ;;  %p2175_p12 = por %p321_p8, %p2137_p2 }
  0x25   : > { %p309_p11 = scmp.eq.s32.totalorder %s308_s29, 0  ;;  %p2187_p13 = por %p327_p9, %p2152_p6 }
  0x26   : > { %s2594_s11 = scalar_select %p2175_p12, 1, 0 }
  0x27   : > { %s2180_s30 = scalar_select %p281_p10, %s1980_s22, %s283_s13  }
  0x28   : > { %2595 = sst [smem:[#allocation28_spill]] %s2594_s11  ;;  %p1500_p0 = scmp.ge.s32.totalorder %s2000_s27, 1 }
  0x29   : > { %2596 = sst [smem:[#allocation29_spill]] %s2180_s30  ;;  %p335_p1 = scmp.lt.s32.totalorder %s2000_s27, 9 }
  0x2a   : > { %s2183_s25 = scalar_select %p309_p11, %s1968_s19, %s311_s10  }
  0x2b   : > { %s2598_s5 = scalar_select %p2187_p13, 1, 0 }
  0x2c   : > { %2597 = sst [smem:[#allocation30_spill]] %s2183_s25  ;;  %s2600_s12 = sadd.s32 4294967295, %s2000_s27  }
  0x2d   : > { %2599 = sst [smem:[#allocation31_spill]] %s2598_s5  ;;  %p2195_p4 = scmp.eq.s32.totalorder %s2600_s12, 0 }
  0x2e   : > { %p2199_p2 = pnand %p1500_p0, %p335_p1  ;;  %s2603_s8 = sld [smem:[#allocation33_spill]] }
  0x2f   : > { %s2601_s20 = scalar_select %p2195_p4, 1, 0 }
  0x30   : > { %s2602_s28 = scalar_select %p2199_p2, 1, 0 }
  0x31   : > { %p1644_p5 = pneg %p2199_p2  ;;  %s2604_s9 = sld [smem:[#allocation34_spill]] }
  0x33   : > { %p2213_p6 = pnand %p2195_p4, %p1644_p5 }
  0x34   : > { %s360_s14 = sshll.u32 %s2603_s8, 4  ;;  %s361_s14 = int_to_ptr.vmem [resolvable:$true] %s360_s14 }
  0x35   : > { %s1816_s30 = scalar_lea.vmem %s361_s14, 64  ;;  %p1818_p9 = pneg %p2213_p6 }
  0x36   : > { %p1817_p8 = scmp.ne.s32.totalorder %s361_s14, %s1816_s30  ;;  %p1824_p0 = scmp.lt.s32.totalorder %s361_s14, %s361_s14 }
  0x37   : > { %s371_s26 = sshll.u32 %s2604_s9, 4  ;;  %p1825_p1 = scmp.lt.s32.totalorder %s1816_s30, %s1816_s30  ;;  %s372_s26 = int_to_ptr.vmem [resolvable:$true] %s371_s26 }
  0x38   : > { %p1819_p10 = pnand %p1818_p9, %p1817_p8 }
  0x39   : > { %p1826_p13 = por %p1825_p1, %p1824_p0 }
  0x3a   : > { %p1820_p11 = pneg %p1819_p10 }
  0x3c   : > { %p1827_p7 = pnand %p1826_p13, %p1820_p11 }
  0x3e   : > { %1830 = shalt.err (!%p1827_p7)
}
  0x3f   : > { %s2002_s13 = smov [#allocation4]   ;;  %s1831_s10 = scalar_lea.vmem %s372_s26, 16 }
  0x40   : > { %1647 = dma.vmem_to_smem (!%p2213_p6), %s361_s14, 64, %s2002_s13, [#allocation6]  }
  0x41   : > { %p1832_p5 = scmp.ne.s32.totalorder %s372_s26, %s1831_s10  ;;  %p1839_p4 = scmp.lt.s32.totalorder %s372_s26, %s372_s26 }
  0x42   : > { %p1840_p2 = scmp.lt.s32.totalorder %s1831_s10, %s1831_s10 }
  0x43   : > { %p1834_p3 = pnand %p1832_p5, %p1818_p9 }
  0x44   : > { %p1841_p8 = por %p1840_p2, %p1839_p4 }
  0x45   : > { %p1835_p12 = pneg %p1834_p3 }
  0x47   : > { %p1842_p10 = pnand %p1841_p8, %p1835_p12 }
  0x49   : > { %1845 = shalt.err (!%p1842_p10)
}
  0x4a   : > { %s2003_s16 = smov [#allocation7]   ;;  %p2606_p13 = scmp.ne.s32.totalorder %s2602_s28, 0 }
  0x4b   : > { %1650 = dma.vmem_to_smem (!%p2213_p6), %s372_s26, 16, %s2003_s16, [#allocation8]  }
  0x4c   : > { %424 = sbr.rel (%p2606_p13) target bundleno = 1303 (0x517), region = 60  ;;  %p2607_p7 = scmp.ne.s32.totalorder (!%p2606_p13), %s2601_s20, 0 }
  0x51   : > { %1943 = dma.done.wait (%p2607_p7), [#allocation6], 64  }
  0x52   : > { %1945 = vsyncadd (%p2607_p7), [#allocation6], 4294967232 }
  0x53   : > { %1947 = dma.done.wait (%p2607_p7), [#allocation8], 16  }
  0x54   : > { %1949 = vsyncadd (%p2607_p7), [#allocation8], 4294967280 }
  0x55   : > { %434 = sfence }
  0x56   : > { %s2563_s26 = sand.u32 1, %s1976_s21   ;;  %s2565_s30 = sand.u32 1, %s1964_s18  }
  0x57   : > { %s1507_s28 = sshll.u32 %s2563_s26, 4  ;;  %s1508_s14 = sshll.u32 %s2565_s30, 6 }
  0x58   : > { %s1509_s29 = sshll.u32 %s1984_s23, 3  ;;  %p497_p3 = scmp.lt.s32.totalorder %s1988_s24, 1 }
  0x59   : > { %p499_p12 = scmp.lt.s32.totalorder %s1509_s29, 31  ;;  %p513_p4 = scmp.lt.s32.totalorder %s1984_s23, 3 }
  0x5a   : > { %s498_s20 = scalar_select %p497_p3, %s1988_s24, 1 }
  0x5b   : > { %s2645_s29 = smov (!%p499_p12, %s1509_s29), 31  ;;  %p1518_p2 = scmp.ne.s32.totalorder %s1984_s23, 0 }
  0x5c   : > { %s1510_s12 = sshll.u32 %s498_s20, 5  ;;  %s1585_s13 = sshll.u32 %s498_s20, 4 }
  0x5d   : > { %s502_s10 = sadd.s32 %s1510_s12, %s2645_s29  ;;  %s510_s9 = scalar_lea.vmem %s2535_s1, %s1585_s13 }
  0x5e   : > { %s1511_s22 = sshll.u32 %s502_s10, 3  ;;  %s1514_s25 = sshll.u32 %s498_s20, 2 }
  0x5f   : > { %s2249_s5 = scalar_lea.vmem %s2534_s0, %s1511_s22  ;;  %s2254_s15 = scalar_lea.vmem %s2537_s3, %s1585_s13 }
  0x60   : > { %s514_s27 = scalar_select %p513_p4, %s1984_s23, 3 }
  0x61   : > { %s2262_s10 = scalar_lea.vmem [#allocation9], %s1507_s28  ;;  %s2264_s20 = scalar_lea.vmem [#allocation10], %s1508_s14 }
  0x62   : > { %s516_s21 = sadd.s32 %s1514_s25, %s514_s27  ;;  %529 = sbr.rel (%p1518_p2) target bundleno = 315 (0x13b), region = 72 }
  0x63   : > { %s1515_s11 = sshll.u32 %s516_s21, 2  ;;  %s1534_s25 = sld [smem:[#allocation7 + $0x2]] (!%p1518_p2) }
  0x64   : > { %s2260_s8 = scalar_lea.vmem %s2536_s2, %s1515_s11  ;;  %s1531_s11 = sld [smem:[#allocation7 + $0x1]] (!%p1518_p2) }
  0x65   : > { %s1537_s27 = sld [smem:[#allocation7 + $0x3]] (!%p1518_p2) }
  0x67   : > { %v536_v0 = vld [vmem:[%s510_s9 + $0x8] sm:$0xff]  ;;  %v535_v1 = vld [vmem:[%s510_s9] sm:$0xff]  ;;  %vm567_vm0 = vcmask 64512   ;;  %v533_v3 = vld [vmem:[%s2540_s6 + $0x18] sm:$0xff]  ;;  %v2004_v4 = vmov 0.0   ;;  %v2005_v9 = vmov 0  }
  0x68   : > { %613 = vmatprep.subr.mxu0 %v536_v0  ;;  %1630 = vmatprep.subr.mxu1 %v536_v0  ;;  %v530_v2 = vld [vmem:[%s2540_s6] sm:$0xff]  ;;  %v539_v6 = vld [vmem:[%s2541_s7 + $0x10] sm:$0xff]  ;;  %v531_v7 = vld [vmem:[%s2540_s6 + $0x8] sm:$0xff]  ;;  %s721_s9 = sld [smem:[#allocation7]]  ;;  %vm724_vm1 = vcmask 519168  }
  0x69   : > { %614 = vmatpush1.msra.mxu0 %v535_v1  ;;  %1631 = vmatpush1.msra.mxu1 %v535_v1  ;;  %v537_v5 = vld [vmem:[%s2541_s7] sm:$0xff]  ;;  %v538_v10 = vld [vmem:[%s2541_s7 + $0x8] sm:$0xff]  ;;  %v540_v11 = vld [vmem:[%s2541_s7 + $0x18] sm:$0xff]  ;;  %v736_v22 = vstv %s1534_s25 }
  0x6a   : > { %647 = vmatprep.mubr.f32.mxu0 %v2004_v4  ;;  %665 = vmatprep.mubr.f32.mxu1 %v2004_v4  ;;  %v534_v8 = vld [vmem:[%s2540_s6 + $0x20] sm:$0xf]  ;;  %v532_v12 = vld [vmem:[%s2540_s6 + $0x10] sm:$0xff]  ;;  %v1530_v16 = vld [vmem:[%s2254_s15 + $0x4] sm:$0xf]  ;;  %v729_v19 = vstv %s1531_s11 }
  0x6b   : > { %1519 = vmatmul.mubr.msk.f32.vlgmr.msra.gmra.mxu0 %vm567_vm0, %v530_v2  ;;  %1522 = vmatmul.mubr.msk.f32.vlgmr.msra.gmra.mxu1 %vm567_vm0, %v533_v3  ;;  %v541_v13 = vld [vmem:[%s2541_s7 + $0x20] sm:$0xf]  ;;  %v1533_v17 = vld [vmem:[%s2254_s15 + $0x8] sm:$0xf]  ;;  %v1536_v20 = vld [vmem:[%s2254_s15 + $0xc] sm:$0xf]  ;;  %v730_v21 = vadd.f32 %v1530_v16, %v729_v19  ;;  %v743_v24 = vstv %s1537_s27 }
  0x6c   : > { %653 = vmatprep.mubr.f32.mxu0 %v2004_v4  ;;  %671 = vmatprep.mubr.f32.mxu1 %v2004_v4  ;;  %v720_v14 = vld [vmem:[%s2254_s15] sm:$0xf]  ;;  %v737_v23 = vadd.f32 %v1533_v17, %v736_v22  ;;  %v744_v25 = vadd.f32 %v1536_v20, %v743_v24 }
  0x6d   : > { %1760 = vset.pattern.permute.xlu0 %v2005_v9  ;;  %1761 = vset.pattern.permute.xlu1 %v2005_v9  ;;  %1532 = vst.msk [vmem:[%s2262_s10 + $0x4] sm:$0xf] %vm724_vm1, %v730_v21 }
  0x6e   : > { %544 = vperm.xlu0 %1760, %v537_v5   ;;  %554 = vperm.xlu1 %1761, %v539_v6   ;;  %v722_v15 = vstv %s721_s9  ;;  %1535 = vst.msk [vmem:[%s2262_s10 + $0x8] sm:$0xf] %vm724_vm1, %v737_v23  ;;  %1538 = vst.msk [vmem:[%s2262_s10 + $0xc] sm:$0xf] %vm724_vm1, %v744_v25 }
  0x6f   : > { %1520 = vmatmul.mubr.msk.f32.gmra.mxu0 %vm567_vm0, %v531_v7  ;;  %1523 = vmatmul.mubr.msk.f32.gmra.mxu1 %vm567_vm0, %v534_v8  ;;  %v723_v18 = vadd.f32 %v722_v15, %v720_v14 }
  0x70   : > { %659 = vmatprep.mubr.f32.mxu0 %v2004_v4 }
  0x71   : > { %725 = vst.msk [vmem:[%s2262_s10] sm:$0xf] %vm724_vm1, %v723_v18 }
  0x72   : > { %549 = vperm.xlu0 %1760, %v538_v10   ;;  %559 = vperm.xlu1 %1761, %v540_v11  }
  0x73   : > { %1521 = vmatmul.mubr.msk.f32.gmra.mxu0 %vm567_vm0, %v532_v12 }
  0x76   : > { %564 = vperm.xlu0 %1760, %v541_v13  }
  0xe9   : > { %v555_v26 = vpop.permute.xlu1 %554  ;;  %v545_v27 = vpop.permute.xlu0 %544 }
  0xed   : > { %v560_v28 = vpop.permute.xlu1 %559  ;;  %v550_v29 = vpop.permute.xlu0 %549 }
  0xf1   : > { %v565_v40 = vpop.permute.xlu0 %564 }
 0x12b   : > { %v649_v30 = vpop.f32.mrf.mxu0  ;;  %v667_v31 = vpop.f32.mrf.mxu1 }
 0x12c   : > { %v668_v32 = vadd.f32 %v667_v31, %v560_v28  ;;  %v650_v35 = vadd.f32 %v649_v30, %v545_v27 }
 0x12d   : > { %v651_v33 = vpop.f32.mrf.mxu0  ;;  %v669_v34 = vpop.f32.mrf.mxu1 }
 0x12e   : > { %v652_v36 = vadd.f32 %v651_v33, %v545_v27  ;;  %v670_v37 = vadd.f32 %v669_v34, %v560_v28 }
 0x12f   : > { %v655_v38 = vpop.f32.mrf.mxu0  ;;  %v673_v39 = vpop.f32.mrf.mxu1 }
 0x130   : > { %v1587_v41 = vpack.c.bf16 %v652_v36, %v650_v35  ;;  %v1590_v42 = vpack.c.bf16 %v670_v37, %v668_v32  ;;  %v656_v45 = vadd.f32 %v655_v38, %v550_v29  ;;  %v674_v46 = vadd.f32 %v673_v39, %v565_v40 }
 0x131   : > { %v657_v43 = vpop.f32.mrf.mxu0  ;;  %v675_v44 = vpop.f32.mrf.mxu1 }
 0x132   : > { %702 = vst [vmem:[#allocation2 + $0x10] sm:$0xff] %v1587_v41  ;;  %705 = vst [vmem:[#allocation2 + $0x8] sm:$0xff] %v1590_v42  ;;  %v658_v47 = vadd.f32 %v657_v43, %v550_v29  ;;  %v676_v48 = vadd.f32 %v675_v44, %v565_v40 }
 0x133   : > { %v661_v49 = vpop.f32.mrf.mxu0 }
 0x134   : > { %v1588_v50 = vpack.c.bf16 %v658_v47, %v656_v45  ;;  %v1528_v51 = vpack.c.bf16 %v676_v48, %v674_v46  ;;  %v662_v53 = vadd.f32 %v661_v49, %v555_v26 }
 0x135   : > { %v663_v52 = vpop.f32.mrf.mxu0 }
 0x136   : > { %703 = vst [vmem:[#allocation2] sm:$0xff] %v1588_v50  ;;  %1529 = vst.sshfl [vmem:[#allocation3] sm:$0x33 pattern:$0x76325410] %v1528_v51  ;;  %v664_v54 = vadd.f32 %v663_v52, %v555_v26 }
 0x138   : > { %v1589_v55 = vpack.c.bf16 %v664_v54, %v662_v53 }
 0x13a   : > { %704 = vst [vmem:[#allocation2 + $0x18] sm:$0xff] %v1589_v55 }
 0x13b PF: > { %v755_v56 = vld [vmem:[%s2538_s4] sm:$0xf]  ;;  %vm788_vm2 = vcmask 1043456   ;;  %vm763_vm3 = vcmask 31744   ;;  %v748_v58 = vld [vmem:[%s2249_s5 + $0x8] sm:$0xff]  ;;  %v749_v59 = vld [vmem:[%s2249_s5 + $0x10] sm:$0xff] }
 0x13c   : > { %v747_v57 = vld [vmem:[%s2249_s5] sm:$0xff]  ;;  %1616 = vmatprep.subr.msk.mxu0 %vm788_vm2, %v755_v56  ;;  %v750_v61 = vld [vmem:[%s2249_s5 + $0x18] sm:$0xff]  ;;  %v752_v63 = vld [vmem:[%s2249_s5 + $0x28] sm:$0xff]  ;;  %v2006_v5 = vmov 0   ;;  %s2608_s14 = sld [smem:[#allocation32_spill]]  ;;  %vm925_vm4 = vcmask 261120  }
 0x13d   : > { %1618 = vmatprep.mubr.msk.f32.mxu0 %vm763_vm3, %v747_v57  ;;  %1617 = vmatpush3.msk.msra.mxu0 %vm788_vm2, %v755_v56  ;;  %v751_v62 = vld [vmem:[%s2249_s5 + $0x20] sm:$0xff]  ;;  %v753_v0 = vld [vmem:[%s2249_s5 + $0x30] sm:$0xff]  ;;  %v754_v1 = vld [vmem:[%s2249_s5 + $0x38] sm:$0xff]  ;;  %s2609_s5 = sld [smem:[#allocation28_spill]]  ;;  %s1606_s13 = sshll.u32 %s1984_s23, 4 }
 0x13e   : > { %1619 = vmatmul.mubr.msk.f32.vlgmr.msra.gmra.mxu0 %vm763_vm3, %v748_v58  ;;  %v1765_v3 = vld [vmem:[#allocation2 + $0x14] ss:$-16 sps:$4 sm:$0xff]   ;;  %v1767_v4 = vld [vmem:[#allocation2 + $0x10] ss:$-16 sps:$4 sm:$0xff]   ;;  %970 = vmatprep.mubr.bf16.mxu1 %v2006_v5  ;;  %s1581_s16 = sshll.u32 %s1988_s24, 6  ;;  %s1320_s12 = sshll.u32 %s2264_s20, 4  ;;  %s2416_s12 = int_to_ptr.vmem [resolvable:$true] %s1320_s12 }
 0x13f   : > { %1621 = vmatprep.mubr.msk.f32.mxu0 %vm763_vm3, %v749_v59  ;;  %s1317_s29 = sadd.s32 %s1606_s13, %s1581_s16  ;;  %s2610_s22 = sld [smem:[#allocation36_spill]] }
 0x140   : > { %s1582_s17 = sshll.u32 %s1317_s29, 6  ;;  %s2612_s25 = sand.u32 1, %s1964_s18  }
 0x141   : > { %v1762_v60 = vld [vmem:[#allocation2 + $0x1c] ss:$-16 sps:$4 sm:$0xff]   ;;  %v1764_v2 = vld [vmem:[#allocation2 + $0x18] ss:$-16 sps:$4 sm:$0xff]   ;;  %s2425_s27 = scalar_lea.sflag [#allocation11], %s2612_s25  ;;  %s1846_s15 = scalar_lea.vmem %s2416_s12, 1024 }
 0x142   : > { %950 = vmatprep.subr.bf16.mxu1 %v1762_v60  ;;  %1622 = vmatmul.mubr.msk.f32.gmra.mxu0 %vm763_vm3, %v750_v61  ;;  %v1539_v7 = vld [vmem:[%s2608_s14] ss:$0 sm:$0xff]  ;;  %p1847_p6 = scmp.ne.s32.totalorder %s2416_s12, %s1846_s15 }
 0x143   : > { %1624 = vmatprep.mubr.msk.f32.mxu0 %vm763_vm3, %v751_v62  ;;  %951 = vmatpush1.bf16.msra.mxu1 %v1764_v2  ;;  %p2613_p9 = scmp.ne.s32.totalorder %s2609_s5, 0 }
 0x144   : > { %952 = vmatprep.subr.bf16.mxu1 %v1765_v3 }
 0x145   : > { %s2611_s9 = smov %s2610_s22  ;;  %s2421_s11 = scalar_lea.hbm %s2610_s22, %s1582_s17 }
 0x146   : > { %1625 = vmatmul.mubr.msk.f32.gmra.mxu0 %vm763_vm3, %v752_v63  ;;  %p1848_p11 = pnand %p1847_p6, %p2613_p9 }
 0x147   : > { %1627 = vmatprep.mubr.msk.f32.mxu0 %vm763_vm3, %v753_v0  ;;  %953 = vmatpush1.bf16.msra.mxu1 %v1767_v4 }
 0x148   : > { %p1849_p0 = pneg %p1848_p11 }
 0x14a   : > { %1628 = vmatmul.mubr.msk.f32.gmra.mxu0 %vm763_vm3, %v754_v1 }
 0x1fe   : > { %v1620_v6 = vpop.f32.mrf.mxu0 }
 0x1ff   : > { %v864_v9 = vadd.f32 %v1620_v6, %v1539_v7 }
 0x200   : > { %v858_v8 = vpop.f32.mrf.mxu0 }
 0x201   : > { %v859_v10 = vadd.f32 %v1539_v7, %v858_v8 }
 0x202   : > { %v1623_v11 = vpop.f32.mrf.mxu0 }
 0x203   : > { %v897_v12 = vpack.c.bf16 %v864_v9, %v859_v10  ;;  %v874_v14 = vadd.f32 %v1623_v11, %v1539_v7 }
 0x204   : > { %v868_v13 = vpop.f32.mrf.mxu0 }
 0x205   : > { %1553 = vmatmul.mubr.msk.bf16.vlgmr.msra.gmra.mxu1 %vm925_vm4, %v897_v12  ;;  %v869_v15 = vadd.f32 %v1539_v7, %v868_v13 }
 0x206   : > { %980 = vmatprep.mubr.bf16.mxu1 %v2006_v5  ;;  %v1626_v16 = vpop.f32.mrf.mxu0 }
 0x207   : > { %v898_v17 = vpack.c.bf16 %v874_v14, %v869_v15  ;;  %v884_v19 = vadd.f32 %v1626_v16, %v1539_v7 }
 0x208   : > { %v878_v18 = vpop.f32.mrf.mxu0 }
 0x209   : > { %v879_v20 = vadd.f32 %v1539_v7, %v878_v18 }
 0x20a   : > { %v1629_v21 = vpop.f32.mrf.mxu0 }
 0x20b   : > { %v899_v22 = vpack.c.bf16 %v884_v19, %v879_v20  ;;  %v894_v24 = vadd.f32 %v1629_v21, %v1539_v7 }
 0x20c   : > { %v888_v23 = vpop.f32.mrf.mxu0 }
 0x20d   : > { %1554 = vmatmul.mubr.msk.bf16.gmra.mxu1 %vm925_vm4, %v898_v17  ;;  %v889_v25 = vadd.f32 %v1539_v7, %v888_v23 }
 0x20e   : > { %990 = vmatprep.mubr.bf16.mxu1 %v2006_v5 }
 0x20f   : > { %v900_v26 = vpack.c.bf16 %v894_v24, %v889_v25 }
 0x215   : > { %1555 = vmatmul.mubr.msk.bf16.gmra.mxu1 %vm925_vm4, %v899_v22 }
 0x216   : > { %1000 = vmatprep.mubr.bf16.mxu1 %v2006_v5 }
 0x21d   : > { %1556 = vmatmul.mubr.msk.bf16.gmra.mxu1 %vm925_vm4, %v900_v26 }
 0x2c5   : > { %v2336_v27 = vpop.f32.mrf.mxu1 }
 0x2c7   : > { %v2338_v28 = vpop.f32.mrf.mxu1 }
 0x2c8   : > { %v1011_v50 = vmax.f32 %v2336_v27, %v2338_v28 }
 0x2c9   : > { %v2340_v29 = vpop.f32.mrf.mxu1 }
 0x2cb   : > { %v2342_v30 = vpop.f32.mrf.mxu1 }
 0x2cc   : > { %v1014_v48 = vmax.f32 %v2340_v29, %v2342_v30 }
 0x2cd   : > { %v2344_v31 = vpop.f32.mrf.mxu1 }
 0x2cf   : > { %v2346_v32 = vpop.f32.mrf.mxu1 }
 0x2d0   : > { %v1017_v49 = vmax.f32 %v2344_v31, %v2346_v32 }
 0x2d1   : > { %v986_v33 = vpop.f32.mrf.mxu1 }
 0x2d3   : > { %v988_v34 = vpop.f32.mrf.mxu1 }
 0x2d4   : > { %v1020_v43 = vmax.f32 %v986_v33, %v988_v34 }
 0x2d5   : > { %v992_v35 = vpop.f32.mrf.mxu1 }
 0x2d7   : > { %v994_v36 = vpop.f32.mrf.mxu1 }
 0x2d8   : > { %v1023_v37 = vmax.f32 %v992_v35, %v994_v36 }
 0x2d9   : > { %v996_v38 = vpop.f32.mrf.mxu1 }
 0x2da   : > { %1024 = vmax.xlane.f32.xlu1 %v1023_v37 }
 0x2db   : > { %v998_v39 = vpop.f32.mrf.mxu1 }
 0x2dc   : > { %v1026_v40 = vmax.f32 %v996_v38, %v998_v39 }
 0x2dd   : > { %v1002_v41 = vpop.f32.mrf.mxu1 }
 0x2de   : > { %1027 = vmax.xlane.f32.xlu1 %v1026_v40 }
 0x2df   : > { %v1004_v42 = vpop.f32.mrf.mxu1 }
 0x2e0   : > { %v1029_v44 = vmax.f32 %v1002_v41, %v1004_v42 }
 0x2e1   : > { %v1006_v45 = vpop.f32.mrf.mxu1 }
 0x2e2   : > { %1021 = vmax.xlane.f32.xlu1 %v1020_v43  ;;  %1030 = vmax.xlane.f32.xlu0 %v1029_v44 }
 0x2e3   : > { %v1008_v46 = vpop.f32.mrf.mxu1 }
 0x2e4   : > { %v1032_v47 = vmax.f32 %v1006_v45, %v1008_v46 }
 0x2e6   : > { %1015 = vmax.xlane.f32.xlu1 %v1014_v48  ;;  %1033 = vmax.xlane.f32.xlu0 %v1032_v47 }
 0x2ea   : > { %1018 = vmax.xlane.f32.xlu0 %v1017_v49 }
 0x2ee   : > { %1012 = vmax.xlane.f32.xlu0 %v1011_v50 }
 0x363   : > { %v1025_v51 = vpop.xlane.xlu1 %1024 }
 0x364   : > { %v1043_v52 = vsub.f32 %v992_v35, %v1025_v51  ;;  %v1044_v53 = vsub.f32 %v994_v36, %v1025_v51  ;;  %v2390_v51 = vld.sshfl [vmem:[#allocation3] sm:$0x33 pattern:$0x76325410] }
 0x366   : > { %v1067_v56 = vmul.f32 1.442695, %v1043_v52  ;;  %v1069_v59 = vmul.f32 1.442695, %v1044_v53  ;;  %v1196_v52 = vcombine.high %v2390_v51, %v2390_v51 }
 0x367   : > { %v1028_v54 = vpop.xlane.xlu1 %1027 }
 0x368   : > { %v1045_v57 = vsub.f32 %v996_v38, %v1028_v54  ;;  %v1046_v60 = vsub.f32 %v998_v39, %v1028_v54  ;;  %1768 = vpow2.f32 %v1067_v56  ;;  %1231 = vmatprep.mubr.bf16.mxu0 %v1196_v52 }
 0x369   : > { %1770 = vpow2.f32 %v1069_v59 }
 0x36a   : > { %v1071_v2 = vmul.f32 1.442695, %v1045_v57  ;;  %v1073_v4 = vmul.f32 1.442695, %v1046_v60 }
 0x36b   : > { %v1031_v55 = vpop.xlane.xlu0 %1030  ;;  %v1022_v63 = vpop.xlane.xlu1 %1021 }
 0x36c   : > { %v1047_v58 = vsub.f32 %v1002_v41, %v1031_v55  ;;  %v1048_v61 = vsub.f32 %v1004_v42, %v1031_v55  ;;  %v1041_v6 = vsub.f32 %v986_v33, %v1022_v63  ;;  %v1042_v8 = vsub.f32 %v988_v34, %v1022_v63 }
 0x36e   : > { %v1075_v62 = vmul.f32 1.442695, %v1047_v58  ;;  %v1077_v0 = vmul.f32 1.442695, %v1048_v61  ;;  %v1063_v14 = vmul.f32 1.442695, %v1041_v6 }
 0x36f   : > { %v1034_v1 = vpop.xlane.xlu0 %1033  ;;  %v1016_v13 = vpop.xlane.xlu1 %1015  ;;  %v1065_v17 = vmul.f32 1.442695, %v1042_v8 }
 0x370   : > { %v1049_v3 = vsub.f32 %v1006_v45, %v1034_v1  ;;  %v1050_v5 = vsub.f32 %v1008_v46, %v1034_v1  ;;  %1772 = vpow2.f32 %v1075_v62  ;;  %v1037_v19 = vsub.f32 %v2340_v29, %v1016_v13 }
 0x371   : > { %1774 = vpow2.f32 %v1077_v0  ;;  %v1038_v22 = vsub.f32 %v2342_v30, %v1016_v13 }
 0x372   : > { %v1079_v7 = vmul.f32 1.442695, %v1049_v3  ;;  %v1081_v9 = vmul.f32 1.442695, %v1050_v5  ;;  %1776 = vpow2.f32 %v1071_v2  ;;  %v1055_v25 = vmul.f32 1.442695, %v1037_v19 }
 0x373   : > { %v1019_v10 = vpop.xlane.xlu0 %1018  ;;  %1778 = vpow2.f32 %v1073_v4 }
 0x374   : > { %v1039_v11 = vsub.f32 %v2344_v31, %v1019_v10  ;;  %v1040_v12 = vsub.f32 %v2346_v32, %v1019_v10  ;;  %1780 = vpow2.f32 %v1079_v7  ;;  %v1057_v31 = vmul.f32 1.442695, %v1038_v22 }
 0x375   : > { %1782 = vpow2.f32 %v1081_v9  ;;  %v2360_v26 = vpop.eup %1768 }
 0x376   : > { %v1059_v15 = vmul.f32 1.442695, %v1039_v11  ;;  %v1061_v16 = vmul.f32 1.442695, %v1040_v12  ;;  %v1771_v32 = vpop.eup %1770 }
 0x377   : > { %v1013_v18 = vpop.xlane.xlu0 %1012  ;;  %v1095_v37 = vadd.f32 %v1771_v32, %v2360_v26 }
 0x378   : > { %1784 = vpow2.f32 %v1059_v15  ;;  %v1035_v20 = vsub.f32 %v2336_v27, %v1013_v18  ;;  %v1036_v21 = vsub.f32 %v2338_v28, %v1013_v18 }
 0x379   : > { %1786 = vpow2.f32 %v1061_v16 }
 0x37a   : > { %1788 = vpow2.f32 %v1063_v14  ;;  %v1051_v23 = vmul.f32 1.442695, %v1035_v20  ;;  %v1053_v24 = vmul.f32 1.442695, %v1036_v21 }
 0x37b   : > { %1790 = vpow2.f32 %v1065_v17 }
 0x37c   : > { %1792 = vpow2.f32 %v1051_v23 }
 0x37d   : > { %1794 = vpow2.f32 %v1053_v24  ;;  %v1773_v29 = vpop.eup %1772 }
 0x37e   : > { %v1775_v33 = vpop.eup %1774  ;;  %1796 = vpow2.f32 %v1055_v25 }
 0x37f   : > { %v2362_v27 = vpop.eup %1776  ;;  %1798 = vpow2.f32 %v1057_v31  ;;  %v1101_v28 = vadd.f32 %v1775_v33, %v1773_v29 }
 0x380   : > { %v2364_v30 = vpop.eup %1778 }
 0x381   : > { %v1781_v34 = vpop.eup %1780  ;;  %1102 = vadd.xlane.f32.xlu0 %v1101_v28  ;;  %v1098_v44 = vadd.f32 %v2364_v30, %v2362_v27 }
 0x382   : > { %v1783_v35 = vpop.eup %1782 }
 0x383   : > { %v1104_v38 = vadd.f32 %v1783_v35, %v1781_v34 }
 0x385   : > { %v2366_v36 = vpop.eup %1784  ;;  %1096 = vadd.xlane.f32.xlu0 %v1095_v37  ;;  %1105 = vadd.xlane.f32.xlu1 %v1104_v38 }
 0x386   : > { %v1787_v39 = vpop.eup %1786 }
 0x387   : > { %v2369_v40 = vpop.eup %1788  ;;  %v1089_v41 = vadd.f32 %v1787_v39, %v2366_v36 }
 0x388   : > { %v2372_v42 = vpop.eup %1790 }
 0x389   : > { %v2374_v43 = vpop.eup %1792  ;;  %1099 = vadd.xlane.f32.xlu1 %v1098_v44  ;;  %1090 = vadd.xlane.f32.xlu0 %v1089_v41  ;;  %v1092_v48 = vadd.f32 %v2372_v42, %v2369_v40 }
 0x38a   : > { %v2378_v45 = vpop.eup %1794 }
 0x38b   : > { %v1083_v46 = vadd.f32 %v2378_v45, %v2374_v43  ;;  %v2382_v47 = vpop.eup %1796 }
 0x38c   : > { %v2386_v49 = vpop.eup %1798 }
 0x38d   : > { %1093 = vadd.xlane.f32.xlu1 %v1092_v48  ;;  %1084 = vadd.xlane.f32.xlu0 %v1083_v46  ;;  %v1086_v50 = vadd.f32 %v2386_v49, %v2382_v47 }
 0x391   : > { %1087 = vadd.xlane.f32.xlu1 %v1086_v50 }
 0x40a   : > { %v1103_v53 = vpop.xlane.xlu0 %1102 }
 0x40b   : > { %1800 = vrcp.f32 %v1103_v53 }
 0x40e   : > { %v1106_v54 = vpop.xlane.xlu1 %1105  ;;  %v1097_v55 = vpop.xlane.xlu0 %1096 }
 0x40f   : > { %1802 = vrcp.f32 %v1106_v54 }
 0x410   : > { %1804 = vrcp.f32 %v1097_v55 }
 0x412   : > { %v1100_v56 = vpop.xlane.xlu1 %1099  ;;  %v1091_v57 = vpop.xlane.xlu0 %1090 }
 0x413   : > { %1806 = vrcp.f32 %v1100_v56 }
 0x414   : > { %1808 = vrcp.f32 %v1091_v57 }
 0x416   : > { %v1094_v58 = vpop.xlane.xlu1 %1093  ;;  %v1085_v59 = vpop.xlane.xlu0 %1084 }
 0x417   : > { %1810 = vrcp.f32 %v1094_v58 }
 0x418   : > { %v1801_v60 = vpop.eup %1800  ;;  %1812 = vrcp.f32 %v1085_v59 }
 0x419   : > { %v1127_v61 = vmul.f32 %v1801_v60, %v1773_v29  ;;  %v1128_v62 = vmul.f32 %v1801_v60, %v1775_v33 }
 0x41a   : > { %v1088_v63 = vpop.xlane.xlu1 %1087 }
 0x41b   : > { %1814 = vrcp.f32 %v1088_v63  ;;  %v1597_v0 = vpack.c.bf16 %v1128_v62, %v1127_v61 }
 0x41c   : > { %v1803_v1 = vpop.eup %1802 }
 0x41d   : > { %v1805_v2 = vpop.eup %1804  ;;  %v1129_v3 = vmul.f32 %v1803_v1, %v1781_v34  ;;  %v1130_v4 = vmul.f32 %v1803_v1, %v1783_v35  ;;  %1185 = vst [vmem:[%s2264_s20 + $0x30] sm:$0xff] %v1597_v0 }
 0x41e   : > { %v1123_v5 = vmul.f32 %v1805_v2, %v2360_v26  ;;  %v1124_v6 = vmul.f32 %v1805_v2, %v1771_v32 }
 0x41f   : > { %v1138_v7 = vpack.c.bf16 %v1130_v4, %v1128_v62  ;;  %v1598_v8 = vpack.c.bf16 %v1130_v4, %v1129_v3  ;;  %v1137_v9 = vpack.c.bf16 %v1129_v3, %v1127_v61 }
 0x420   : > { %v1807_v10 = vpop.eup %1806  ;;  %v1595_v11 = vpack.c.bf16 %v1124_v6, %v1123_v5 }
 0x421   : > { %v1809_v12 = vpop.eup %1808  ;;  %1186 = vst [vmem:[%s2264_s20 + $0x38] sm:$0xff] %v1598_v8  ;;  %1207 = vmatprep.subr.bf16.mxu0 %v1138_v7  ;;  %v1125_v13 = vmul.f32 %v1807_v10, %v2362_v27  ;;  %v1126_v14 = vmul.f32 %v1807_v10, %v2364_v30 }
 0x422   : > { %1208 = vmatpush1.bf16.xpose.msra.mxu0 %v1137_v9  ;;  %1183 = vst [vmem:[%s2264_s20 + $0x20] sm:$0xff] %v1595_v11  ;;  %v1119_v15 = vmul.f32 %v1809_v12, %v2366_v36  ;;  %v1120_v16 = vmul.f32 %v1809_v12, %v1787_v39 }
 0x423   : > { %v1136_v17 = vpack.c.bf16 %v1126_v14, %v1124_v6  ;;  %v1596_v18 = vpack.c.bf16 %v1126_v14, %v1125_v13  ;;  %v1135_v32 = vpack.c.bf16 %v1125_v13, %v1123_v5 }
 0x424   : > { %v1811_v19 = vpop.eup %1810  ;;  %v1593_v20 = vpack.c.bf16 %v1120_v16, %v1119_v15 }
 0x425   : > { %v1813_v21 = vpop.eup %1812  ;;  %1184 = vst [vmem:[%s2264_s20 + $0x28] sm:$0xff] %v1596_v18  ;;  %1209 = vmatprep.subr.bf16.mxu0 %v1136_v17  ;;  %v1121_v22 = vmul.f32 %v1811_v19, %v2369_v40  ;;  %v1122_v23 = vmul.f32 %v1811_v19, %v2372_v42 }
 0x426   : > { %1181 = vst [vmem:[%s2264_s20 + $0x10] sm:$0xff] %v1593_v20  ;;  %v1115_v24 = vmul.f32 %v1813_v21, %v2374_v43  ;;  %v1116_v25 = vmul.f32 %v1813_v21, %v2378_v45 }
 0x427   : > { %v1594_v26 = vpack.c.bf16 %v1122_v23, %v1121_v22  ;;  %v1134_v33 = vpack.c.bf16 %v1122_v23, %v1120_v16  ;;  %v1133_v34 = vpack.c.bf16 %v1121_v22, %v1119_v15 }
 0x428   : > { %v1815_v31 = vpop.eup %1814  ;;  %v1591_v29 = vpack.c.bf16 %v1116_v25, %v1115_v24 }
 0x429   : > { %1182 = vst [vmem:[%s2264_s20 + $0x18] sm:$0xff] %v1594_v26  ;;  %v1117_v27 = vmul.f32 %v1815_v31, %v2382_v47  ;;  %v1118_v28 = vmul.f32 %v1815_v31, %v2386_v49 }
 0x42a   : > { %1210 = vmatpush1.bf16.xpose.msra.mxu0 %v1135_v32  ;;  %1179 = vst [vmem:[%s2264_s20] sm:$0xff] %v1591_v29 }
 0x42b   : > { %1211 = vmatprep.subr.bf16.mxu0 %v1134_v33  ;;  %v1592_v30 = vpack.c.bf16 %v1118_v28, %v1117_v27  ;;  %v1132_v35 = vpack.c.bf16 %v1118_v28, %v1116_v25  ;;  %v1131_v36 = vpack.c.bf16 %v1117_v27, %v1115_v24 }
 0x42d   : > { %1180 = vst [vmem:[%s2264_s20 + $0x8] sm:$0xff] %v1592_v30  ;;  %s2007_s20 = smov [#allocation10]  }
 0x42e   : > { %s1850_s26 = sshll.u32 %s2007_s20, 4  ;;  %s1851_s26 = int_to_ptr.vmem [resolvable:$false] %s1850_s26 }
 0x42f   : > { %s1852_s30 = scalar_lea.vmem %s1851_s26, 2048  ;;  %p1853_p1 = scmp.lt.s32.totalorder %s2416_s12, %s1851_s26 }
 0x430   : > { %p1854_p5 = scmp.lt.s32.totalorder %s1852_s30, %s1846_s15 }
 0x432   : > { %1212 = vmatpush1.bf16.xpose.msra.mxu0 %v1133_v34  ;;  %p1855_p8 = por %p1854_p5, %p1853_p1 }
 0x433   : > { %1213 = vmatprep.subr.bf16.mxu0 %v1132_v35 }
 0x434   : > { %p1856_p10 = pnand %p1855_p8, %p1849_p0 }
 0x43a   : > { %1214 = vmatpush1.bf16.xpose.msra.mxu0 %v1131_v36 }
 0x441   : > { %1232 = vmatmul.mubr.bf16.vlgmr.msra.gmra.mxu0 %v2390_v51 }
 0x442   : > { %1859 = shalt.err (!%p1856_p10)
}
 0x443   : > { %s1860_s28 = scalar_lea.hbm %s2421_s11, 1024  ;;  %s1864_s16 = scalar_lea.hbm %s2611_s9, 8192 }
 0x444   : > { %p1861_p13 = scmp.ne.s32.totalorder %s2421_s11, %s1860_s28  ;;  %p1865_p12 = scmp.lt.s32.totalorder %s2421_s11, %s2611_s9 }
 0x445   : > { %p1866_p4 = scmp.lt.s32.totalorder %s1864_s16, %s1860_s28 }
 0x446   : > { %p1862_p7 = pnand %p1861_p13, %p2613_p9 }
 0x447   : > { %p1867_p2 = por %p1866_p4, %p1865_p12 }
 0x448   : > { %p1863_p3 = pneg %p1862_p7 }
 0x44a   : > { %p1868_p6 = pnand %p1867_p2, %p1863_p3 }
 0x44c   : > { %1871 = shalt.err (!%p1868_p6)
}
 0x44d   : > { %s2008_s19 = smov 128   ;;  %s2009_s21 = smov 8   ;;  %v1239_v37 = vld [vmem:[%s2260_s8] sm:$0xf]  ;;  %v1241_v44 = vld [vmem:[%s2262_s10] sm:$0xf] }
 0x44e   : > { %1641 = dma.vmem_to_hbm [thread:$0]  (%p2613_p9), %s2416_s12, 1024, %s2421_s11, %s2425_s27, %s2008_s19, %s2008_s19, %s2009_s21   ;;  %vm1246_vm5 = vcmask 519168  }
 0x44f   : > { %s1250_s22 = sshra.s32 %s1984_s23, 7  ;;  %s1255_s20 = sand.u32 127, %s1984_s23  ;;  %v1566_v45 = vld [vmem:[%s2262_s10 + $0x4] sm:$0xf]  ;;  %v1569_v46 = vld [vmem:[%s2262_s10 + $0x8] sm:$0xf] }
 0x450   : > { %s1599_s25 = sshll.u32 %s1250_s22, 7  ;;  %s1242_s13 = sld [smem:[#allocation4 + %s1984_s23]]  ;;  %v1572_v47 = vld [vmem:[%s2262_s10 + $0xc] sm:$0xf] }
 0x451   : > { %s1600_s15 = sadd.s32 128, %s1599_s25  ;;  %s1602_s26 = sadd.s32 256, %s1599_s25 }
 0x452   : > { %s1604_s30 = sadd.s32 384, %s1599_s25  ;;  %s1256_s28 = sadd.s32 %s1600_s15, %s1255_s20 }
 0x453   : > { %s1266_s14 = sadd.s32 %s1602_s26, %s1255_s20  ;;  %s1276_s16 = sadd.s32 %s1604_s30, %s1255_s20 }
 0x454   : > { %s1257_s29 = sld [smem:[#allocation4 + %s1256_s28]]  ;;  %s1605_s12 = sshll.u32 %s1988_s24, 8 }
 0x455   : > { %s1267_s17 = sld [smem:[#allocation4 + %s1266_s14]]  ;;  %s1301_s11 = sshll.u32 %s2262_s10, 4  ;;  %s2463_s11 = int_to_ptr.vmem [resolvable:$true] %s1301_s11 }
 0x456   : > { %s1277_s5 = sld [smem:[#allocation4 + %s1276_s16]]  ;;  %v1243_v39 = vstv %s1242_s13  ;;  %s1872_s20 = scalar_lea.vmem %s2463_s11, 256 }
 0x457   : > { %s2614_s23 = sld [smem:[#allocation19_spill]]  ;;  %p1873_p9 = scmp.ne.s32.totalorder %s2463_s11, %s1872_s20 }
 0x458   : > { %s2615_s8 = sld [smem:[#allocation25_spill]]  ;;  %s2010_s26 = smov [#allocation9]  }
 0x459   : > { %s2616_s24 = sld [smem:[#allocation35_spill]]  ;;  %s1876_s30 = sshll.u32 %s2010_s26, 4  ;;  %s1877_s30 = int_to_ptr.vmem [resolvable:$false] %s1876_s30 }
 0x45a   : > { %v1258_v40 = vstv %s1257_s29  ;;  %s1878_s28 = scalar_lea.vmem %s1877_s30, 512  ;;  %p1879_p5 = scmp.lt.s32.totalorder %s2463_s11, %s1877_s30 }
 0x45b   : > { %v1268_v41 = vstv %s1267_s17  ;;  %p1880_p8 = scmp.lt.s32.totalorder %s1878_s28, %s1872_s20 }
 0x45c   : > { %v1278_v42 = vstv %s1277_s5 }
 0x45d   : > { %s2618_s22 = sand.u32 1, %s2614_s23   ;;  %p1881_p10 = por %p1880_p8, %p1879_p5 }
 0x45e   : > { %s2471_s25 = scalar_lea.sflag [#allocation5], %s2618_s22  ;;  %p2619_p11 = scmp.ne.s32.totalorder %s2615_s8, 0 }
 0x45f   : > { %s2617_s15 = smov %s2616_s24  ;;  %s2461_s21 = scalar_lea.hbm %s2616_s24, %s1605_s12 }
 0x460   : > { %p1874_p0 = pnand %p1873_p9, %p2619_p11 }
 0x462   : > { %p1875_p1 = pneg %p1874_p0 }
 0x464   : > { %p1882_p13 = pnand %p1881_p10, %p1875_p1 }
 0x501   : > { %v1233_v38 = vpop.f32.mrf.mxu0 }
 0x502   : > { %v1240_v43 = vmul.f32 %v1239_v37, %v1233_v38 }
 0x503   : > { %v1235_v48 = vpop.f32.mrf.mxu0 }
 0x504   : > { %v1244_v49 = vmul.f32 %v1243_v39, %v1240_v43  ;;  %v1259_v50 = vmul.f32 %v1258_v40, %v1240_v43  ;;  %v1269_v51 = vmul.f32 %v1268_v41, %v1240_v43  ;;  %v1279_v52 = vmul.f32 %v1278_v42, %v1240_v43 }
 0x505   : > { %v1236_v53 = vpop.f32.mrf.mxu0 }
 0x506   : > { %v1245_v54 = vadd.f32 %v1244_v49, %v1241_v44  ;;  %v1260_v55 = vadd.f32 %v1566_v45, %v1259_v50  ;;  %v1270_v56 = vadd.f32 %v1569_v46, %v1269_v51  ;;  %v1280_v57 = vadd.f32 %v1572_v47, %v1279_v52 }
 0x507   : > { %v1237_v58 = vpop.f32.mrf.mxu0 }
 0x508   : > { %1247 = vst.msk [vmem:[%s2262_s10] sm:$0xf] %vm1246_vm5, %v1245_v54  ;;  %1568 = vst.msk [vmem:[%s2262_s10 + $0x4] sm:$0xf] %vm1246_vm5, %v1260_v55 }
 0x509   : > { %1571 = vst.msk [vmem:[%s2262_s10 + $0x8] sm:$0xf] %vm1246_vm5, %v1270_v56  ;;  %1574 = vst.msk [vmem:[%s2262_s10 + $0xc] sm:$0xf] %vm1246_vm5, %v1280_v57 }
 0x50a   : > { %1885 = shalt.err (!%p1882_p13)
}
 0x50b   : > { %s1886_s10 = scalar_lea.hbm %s2461_s21, 256  ;;  %s1890_s16 = scalar_lea.hbm %s2617_s15, 512 }
 0x50c   : > { %p1887_p7 = scmp.ne.s32.totalorder %s2461_s21, %s1886_s10  ;;  %p1891_p4 = scmp.lt.s32.totalorder %s2461_s21, %s2617_s15 }
 0x50d   : > { %p1892_p2 = scmp.lt.s32.totalorder %s1890_s16, %s1886_s10 }
 0x50e   : > { %p1888_p3 = pnand %p1887_p7, %p2619_p11 }
 0x50f   : > { %p1893_p6 = por %p1892_p2, %p1891_p4 }
 0x510   : > { %p1889_p12 = pneg %p1888_p3 }
 0x512   : > { %p1894_p9 = pnand %p1893_p6, %p1889_p12 }
 0x514   : > { %1897 = shalt.err (!%p1894_p9)
}
 0x515   : > { %s2011_s5 = smov 64   ;;  %s2012_s12 = smov 4  }
 0x516   : > { %1640 = dma.vmem_to_hbm [thread:$0]  (%p2619_p11), %s2463_s11, 256, %s2461_s21, %s2471_s25, %s2011_s5, %s2011_s5, %s2012_s12  }
 0x517 PF: > { %s2620_s23 = sld [smem:[#allocation23_spill]] }
 0x518   : > { %s2621_s27 = sld [smem:[#allocation18_spill]] }
 0x519   : > { %s2622_s19 = sld [smem:[#allocation27_spill]] }
 0x51d   : > { %p1662_p0 = scmp.ge.s32.totalorder %s2620_s23, 2 }
 0x51e   : > { %s1335_s24 = sand.u32 1, %s2621_s27  }
 0x51f   : > { %p2623_p1 = scmp.ne.s32.totalorder %s2622_s19, 0  ;;  %s1336_s22 = scalar_lea.sflag [#allocation5], %s1335_s24 }
 0x521   : > { %p1652_p5 = pnand %p1662_p0, %p2623_p1 }
 0x523   : > { %p1653_p8 = pneg %p1652_p5 }
 0x525   : > { %1951 = dma.done.wait (%p1653_p8), %s1336_s22, 256  }
 0x526   : > { %1953 = vsyncadd (%p1653_p8), %s1336_s22, 4294967040  ;;  %s2624_s20 = sld [smem:[#allocation16_spill]] }
 0x527   : > { %s2625_s26 = sld [smem:[#allocation31_spill]] }
 0x52c   : > { %s1344_s30 = sand.u32 1, %s2624_s20  }
 0x52d   : > { %p2626_p10 = scmp.ne.s32.totalorder %s2625_s26, 0  ;;  %s1345_s8 = scalar_lea.sflag [#allocation11], %s1344_s30 }
 0x52f   : > { %p1655_p13 = pnand %p1662_p0, %p2626_p10 }
 0x531   : > { %p1656_p7 = pneg %p1655_p13 }
 0x533   : > { %1955 = dma.done.wait (%p1656_p7), %s1345_s8, 1024  }
 0x534   : > { %1957 = vsyncadd (%p1656_p7), %s1345_s8, 4294966272  ;;  %s30_s27 = sadd.s32 1, %s2620_s23   ;;  %s2627_s11 = sld [smem:[#allocation17_spill]] }
 0x535   : > { %p27_p11 = scmp.ge.s32.totalorder %s30_s27, 10   ;;  %s2628_s19 = sld [smem:[#allocation30_spill]] }
 0x536   : > { %s2629_s20 = sld [smem:[#allocation19_spill]]  ;;  %s2636_s17 = smov %s1964_s18 }
 0x537   : > { %s2630_s21 = sld [smem:[#allocation20_spill]] }
 0x538   : > { %s2631_s22 = sld [smem:[#allocation29_spill]]  ;;  %29 = sbr.rel (!%p27_p11) target bundleno = 17 (0x11), region = 143 }
 0x539   : > { %s2632_s23 = sld [smem:[#allocation21_spill]] }
 0x53a   : > { %s2633_s24 = sld [smem:[#allocation22_spill]]  ;;  %s2637_s18 = smov %s2627_s11 }
 0x53b   : > { %s2634_s25 = sld [smem:[#allocation24_spill]] }
 0x53c   : > { %s2635_s26 = sld [smem:[#allocation26_spill]] }
 0x53d   :  { %1350 = vsyncpa [#allocation5], 1 }
 0x53e   :  { %1352 = vsyncpa [#allocation5 + $0x1], 1 }
 0x53f   :  { %1353 = vsyncpa [#allocation11], 1 }
 0x540   :  { %1355 = vsyncpa [#allocation11 + $0x1], 1 }
 0x541   :  { %1356 = vsyncpa [#allocation6], 1 }
 0x542   :  { %1358 = vsyncpa [#allocation6 + $0x1], 1 }
 0x543   :  { %1359 = vsyncpa [#allocation8], 1 }

</bundles_post_ra>
